<compile_context>
chip_gen: v6e
topology: v6e:2x2x1
jax: 0.10.0
libtpu: 0.0.40
codegen_flags: <defaults>
</compile_context>

<pallas_src>
import jax
import jax.numpy as jnp
from jax.experimental import pallas as pl
from jax.experimental.pallas import tpu as pltpu

# Layer dims of My_model4
DIMS = [40, 128, 256, 128, 128, 133]
OUT_PAD = 256  # optional lane-dense padding of the last layer (133 -> 256)


def _round_up(v, m):
    return ((v + m - 1) // m) * m


def _mlp_kernel(x_ref,
                w0_ref, b0_ref,
                w1_ref, b1_ref,
                w2_ref, b2_ref,
                w3_ref, b3_ref,
                w4_ref, b4_ref,
                o_ref):
    """One (tile_b, 40) batch tile through the full 5-layer MLP."""

    def dense(h, w_ref, b_ref, relu):
        # MXU matmul in the weights' dtype (f32 or bf16) with f32 accumulation;
        # bias-add + ReLU stay in f32 on the VPU (free filler under MXU load).
        y = jnp.dot(h.astype(w_ref.dtype), w_ref[...],
                    preferred_element_type=jnp.float32) + b_ref[...]
        return jnp.maximum(y, 0.0) if relu else y

    h = x_ref[...]
    h = dense(h, w0_ref, b0_ref, True)    # 40  -> 128
    h = dense(h, w1_ref, b1_ref, True)    # 128 -> 256
    h = dense(h, w2_ref, b2_ref, True)    # 256 -> 128
    h = dense(h, w3_ref, b3_ref, True)    # 128 -> 128
    h = dense(h, w4_ref, b4_ref, False)   # 128 -> 133 (or 256 if padded)
    o_ref[...] = h.astype(o_ref.dtype)


def prepare_params(params, *, compute_dtype=jnp.float32, pad_output=None):
    """One-time parameter prep (hoisted out of the forward path).

    Casts weights to the compute dtype, reshapes biases to (1, out) f32, and
    (optionally) zero-pads the last layer 133 -> 256 lanes.  Returns the flat
    list [W0, b0, ..., W4, b4] ready to pass to my_model4_forward.
    """
    if pad_output is None:
        # bf16: padded 256 lanes is lane-dense AND only 512 B/row.
        # f32: unpadded 133 lanes (532 B/row) beats padded 256 (1024 B/row).
        pad_output = jnp.dtype(compute_dtype) == jnp.dtype(jnp.bfloat16)

    out_dim = DIMS[-1]
    n_layers = len(params)
    flat = []
    for li, (W, b) in enumerate(params):
        W = jnp.asarray(W)
        b = jnp.asarray(b)
        if li == n_layers - 1 and pad_output:
            W = jnp.pad(W, ((0, 0), (0, OUT_PAD - out_dim)))
            b = jnp.pad(b, (0, OUT_PAD - out_dim))
        flat.append(W.astype(compute_dtype))
        flat.append(b.reshape(1, -1).astype(jnp.float32))
    return flat


def my_model4_forward(x, prepared, *, tile_b=1024):
    """x: (B, 40).  prepared: output of prepare_params().

    Returns (B, 133) in x.dtype.  tile_b is the batch tile (rows / grid step);
    512-2048 are VMEM-safe on v5e/v6e/v7x.
    """
    B, D_in = x.shape
    assert D_in == DIMS[0]
    out_dim = DIMS[-1]

    compute_dtype = prepared[0].dtype            # W0 dtype
    out_lanes = prepared[-2].shape[1]            # W4 width: 133 or 256
    # bf16 packs 2 rows per sublane -> 16-row alignment; f32 -> 8.
    align = 16 if jnp.dtype(compute_dtype) == jnp.dtype(jnp.bfloat16) else 8

    tile_b = max(align, (int(tile_b) // align) * align)
    tile_b = min(tile_b, _round_up(B, align))            # never exceed the batch
    if B >= 2 * align:
        # Keep grid_b >= 2 so the "parallel" batch axis feeds both v7x TCs.
        tile_b = min(tile_b, _round_up(pl.cdiv(B, 2), align))
    grid_b = pl.cdiv(B, tile_b)

    # x tile: (tile_b, 40).  40 == full array dim, so the block is legal; the
    # ragged last batch block reads unspecified rows which are masked on store
    # (and don't exist in the (B, out_lanes) output anyway).  The cast to the
    # compute dtype happens inside the kernel -> no wrapper pad/convert pass.
    in_specs = [pl.BlockSpec((tile_b, DIMS[0]), lambda i: (i, 0))]
    for arr in prepared:
        # Constant (0,0) index_map: weights/biases are fetched once and stay
        # VMEM-resident across the whole batch grid.
        in_specs.append(pl.BlockSpec(arr.shape, lambda i: (0, 0)))

    out_dtype = compute_dtype
    flops = 2 * B * sum(DIMS[i] * DIMS[i + 1] for i in range(len(DIMS) - 1))
    bytes_accessed = (x.size * x.dtype.itemsize
                      + B * out_lanes * jnp.dtype(out_dtype).itemsize
                      + sum(int(a.size) * a.dtype.itemsize for a in prepared))

    out = pl.pallas_call(
        _mlp_kernel,
        out_shape=jax.ShapeDtypeStruct((B, out_lanes), out_dtype),
        grid_spec=pltpu.PrefetchScalarGridSpec(
            num_scalar_prefetch=0,
            grid=(grid_b,),
            in_specs=in_specs,
            out_specs=pl.BlockSpec((tile_b, out_lanes), lambda i: (i, 0)),
        ),
        compiler_params=pltpu.CompilerParams(
            # Batch axis is embarrassingly parallel -> megacore sharding.
            dimension_semantics=("parallel",),
            # Explicit headroom for tile sweeps; only a few MiB actually used
            # at tile_b=1024 (safe on v7x's 64 MiB physical VMEM as well).
            vmem_limit_bytes=32 * 1024 * 1024,
        ),
        cost_estimate=pl.CostEstimate(flops=flops, transcendentals=0,
                                      bytes_accessed=bytes_accessed),
    )(x, *prepared)

    # Drop optional 133->256 lane padding; cast back only if needed (bf16 path).
    out = out[:, :out_dim]
    return out if out.dtype == x.dtype else out.astype(x.dtype)


def init_params(key):
    """Deterministic init mimicking PyTorch's default Linear init
    (uniform in +/- 1/sqrt(fan_in))."""
    params = []
    for li in range(len(DIMS) - 1):
        fan_in, fan_out = DIMS[li], DIMS[li + 1]
        key, kw, kb = jax.random.split(key, 3)
        bound = 1.0 / jnp.sqrt(fan_in)
        W = jax.random.uniform(kw, (fan_in, fan_out), jnp.float32,
                               minval=-bound, maxval=bound)
        b = jax.random.uniform(kb, (fan_out,), jnp.float32,
                               minval=-bound, maxval=bound)
        params.append((W, b))
    return params


def reference_forward(x, params):
    h = x
    for i, (W, b) in enumerate(params):
        h = h @ W + b
        if i < len(params) - 1:
            h = jnp.maximum(h, 0.0)
    return h


if __name__ == "__main__":
    key = jax.random.PRNGKey(0)
    key, kx = jax.random.split(key)

    # Non-multiple-of-tile batch to exercise the ragged last block.
    B = 300
    x = jax.random.normal(kx, (B, DIMS[0]), jnp.float32)
    params = init_params(key)

    ref = reference_forward(x, params)

    # Exact-semantics f32 path (matches the PyTorch module numerics).
    # prepare_params is called once and reused across forward calls.
    prep_f32 = prepare_params(params)                      # f32, unpadded output
    out = my_model4_forward(x, prep_f32, tile_b=1024)
    out = jax.block_until_ready(out)
    assert out.shape == (B, DIMS[-1])
    assert jnp.allclose(out, ref, atol=1e-4, rtol=1e-4), "f32 mismatch vs reference"

    # bf16-weight fast path for v6e/v7x (f32 MXU accumulation kept; activations
    # are also bf16, so this path is NOT bit-exact vs. the PyTorch module).
    prep_bf16 = prepare_params(params, compute_dtype=jnp.bfloat16)  # padded 256-lane bf16 out
    out_bf16 = my_model4_forward(x, prep_bf16, tile_b=1024)
    out_bf16 = jax.block_until_ready(out_bf16)
    assert out_bf16.shape == (B, DIMS[-1])
    rel_err = jnp.max(jnp.abs(out_bf16 - ref)) / (jnp.max(jnp.abs(ref)) + 1e-6)
    assert rel_err < 5e-2, f"bf16 path too far from reference: {rel_err}"

    print("KERNEL_OK")
</pallas_src>

<mosaic_0001>
module attributes {stable_mosaic.version = 11 : i64} {
  func.func @_mlp_kernel(%arg0: i32, %arg1: memref<152x40xf32, #tpu.memory_space<vmem>>, %arg2: memref<40x128xf32, #tpu.memory_space<vmem>>, %arg3: memref<1x128xf32, #tpu.memory_space<vmem>>, %arg4: memref<128x256xf32, #tpu.memory_space<vmem>>, %arg5: memref<1x256xf32, #tpu.memory_space<vmem>>, %arg6: memref<256x128xf32, #tpu.memory_space<vmem>>, %arg7: memref<1x128xf32, #tpu.memory_space<vmem>>, %arg8: memref<128x128xf32, #tpu.memory_space<vmem>>, %arg9: memref<1x128xf32, #tpu.memory_space<vmem>>, %arg10: memref<128x133xf32, #tpu.memory_space<vmem>>, %arg11: memref<1x133xf32, #tpu.memory_space<vmem>>, %arg12: memref<152x133xf32, #tpu.memory_space<vmem>>) attributes {dimension_semantics = [#tpu.dimension_semantics<parallel>], iteration_bounds = array<i64: 2>, scalar_prefetch = 0 : i64, scratch_operands = 0 : i64, tpu.core_type = #tpu.core_type<tc>, window_params = [{transform_indices = @transform_0, window_bounds = array<i64: 152, 40>}, {pipeline_mode = #tpu.pipeline_mode<synchronous>, transform_indices = @transform_1, window_bounds = array<i64: 40, 128>}, {pipeline_mode = #tpu.pipeline_mode<synchronous>, transform_indices = @transform_2, window_bounds = array<i64: 1, 128>}, {pipeline_mode = #tpu.pipeline_mode<synchronous>, transform_indices = @transform_3, window_bounds = array<i64: 128, 256>}, {pipeline_mode = #tpu.pipeline_mode<synchronous>, transform_indices = @transform_4, window_bounds = array<i64: 1, 256>}, {pipeline_mode = #tpu.pipeline_mode<synchronous>, transform_indices = @transform_5, window_bounds = array<i64: 256, 128>}, {pipeline_mode = #tpu.pipeline_mode<synchronous>, transform_indices = @transform_6, window_bounds = array<i64: 1, 128>}, {pipeline_mode = #tpu.pipeline_mode<synchronous>, transform_indices = @transform_7, window_bounds = array<i64: 128, 128>}, {pipeline_mode = #tpu.pipeline_mode<synchronous>, transform_indices = @transform_8, window_bounds = array<i64: 1, 128>}, {pipeline_mode = #tpu.pipeline_mode<synchronous>, transform_indices = @transform_9, window_bounds = array<i64: 128, 133>}, {pipeline_mode = #tpu.pipeline_mode<synchronous>, transform_indices = @transform_10, window_bounds = array<i64: 1, 133>}, {transform_indices = @transform_11, window_bounds = array<i64: 152, 133>}]} {
    %c0 = arith.constant 0 : index
    %c0_0 = arith.constant 0 : index
    %0 = vector.load %arg1[%c0, %c0_0] : memref<152x40xf32, #tpu.memory_space<vmem>>, vector<152x40xf32>
    %c0_1 = arith.constant 0 : index
    %c0_2 = arith.constant 0 : index
    %1 = vector.load %arg2[%c0_1, %c0_2] : memref<40x128xf32, #tpu.memory_space<vmem>>, vector<40x128xf32>
    %cst = arith.constant dense<0.000000e+00> : vector<152x128xf32>
    %2 = tpu.matmul %0, %1, %cst {dimension_numbers = #tpu.dot_dimension_numbers<[1], [0], [0], [1], [0, 0, 1, 1], [], []>} : vector<152x40xf32>, vector<40x128xf32>, vector<152x128xf32> -> vector<152x128xf32>
    %c0_3 = arith.constant 0 : index
    %c0_4 = arith.constant 0 : index
    %3 = vector.load %arg3[%c0_3, %c0_4] : memref<1x128xf32, #tpu.memory_space<vmem>>, vector<1x128xf32>
    %4 = vector.broadcast %3 : vector<1x128xf32> to vector<152x128xf32>
    %5 = arith.addf %2, %4 : vector<152x128xf32>
    %cst_5 = arith.constant 0.000000e+00 : f32
    %6 = vector.broadcast %cst_5 : f32 to vector<152x128xf32>
    %7 = arith.maximumf %5, %6 : vector<152x128xf32>
    %c0_6 = arith.constant 0 : index
    %c0_7 = arith.constant 0 : index
    %8 = vector.load %arg4[%c0_6, %c0_7] : memref<128x256xf32, #tpu.memory_space<vmem>>, vector<128x256xf32>
    %cst_8 = arith.constant dense<0.000000e+00> : vector<152x256xf32>
    %9 = tpu.matmul %7, %8, %cst_8 {dimension_numbers = #tpu.dot_dimension_numbers<[1], [0], [0], [1], [0, 0, 1, 1], [], []>} : vector<152x128xf32>, vector<128x256xf32>, vector<152x256xf32> -> vector<152x256xf32>
    %c0_9 = arith.constant 0 : index
    %c0_10 = arith.constant 0 : index
    %10 = vector.load %arg5[%c0_9, %c0_10] : memref<1x256xf32, #tpu.memory_space<vmem>>, vector<1x256xf32>
    %11 = vector.broadcast %10 : vector<1x256xf32> to vector<152x256xf32>
    %12 = arith.addf %9, %11 : vector<152x256xf32>
    %cst_11 = arith.constant 0.000000e+00 : f32
    %13 = vector.broadcast %cst_11 : f32 to vector<152x256xf32>
    %14 = arith.maximumf %12, %13 : vector<152x256xf32>
    %c0_12 = arith.constant 0 : index
    %c0_13 = arith.constant 0 : index
    %15 = vector.load %arg6[%c0_12, %c0_13] : memref<256x128xf32, #tpu.memory_space<vmem>>, vector<256x128xf32>
    %cst_14 = arith.constant dense<0.000000e+00> : vector<152x128xf32>
    %16 = tpu.matmul %14, %15, %cst_14 {dimension_numbers = #tpu.dot_dimension_numbers<[1], [0], [0], [1], [0, 0, 1, 1], [], []>} : vector<152x256xf32>, vector<256x128xf32>, vector<152x128xf32> -> vector<152x128xf32>
    %c0_15 = arith.constant 0 : index
    %c0_16 = arith.constant 0 : index
    %17 = vector.load %arg7[%c0_15, %c0_16] : memref<1x128xf32, #tpu.memory_space<vmem>>, vector<1x128xf32>
    %18 = vector.broadcast %17 : vector<1x128xf32> to vector<152x128xf32>
    %19 = arith.addf %16, %18 : vector<152x128xf32>
    %cst_17 = arith.constant 0.000000e+00 : f32
    %20 = vector.broadcast %cst_17 : f32 to vector<152x128xf32>
    %21 = arith.maximumf %19, %20 : vector<152x128xf32>
    %c0_18 = arith.constant 0 : index
    %c0_19 = arith.constant 0 : index
    %22 = vector.load %arg8[%c0_18, %c0_19] : memref<128x128xf32, #tpu.memory_space<vmem>>, vector<128x128xf32>
    %cst_20 = arith.constant dense<0.000000e+00> : vector<152x128xf32>
    %23 = tpu.matmul %21, %22, %cst_20 {dimension_numbers = #tpu.dot_dimension_numbers<[1], [0], [0], [1], [0, 0, 1, 1], [], []>} : vector<152x128xf32>, vector<128x128xf32>, vector<152x128xf32> -> vector<152x128xf32>
    %c0_21 = arith.constant 0 : index
    %c0_22 = arith.constant 0 : index
    %24 = vector.load %arg9[%c0_21, %c0_22] : memref<1x128xf32, #tpu.memory_space<vmem>>, vector<1x128xf32>
    %25 = vector.broadcast %24 : vector<1x128xf32> to vector<152x128xf32>
    %26 = arith.addf %23, %25 : vector<152x128xf32>
    %cst_23 = arith.constant 0.000000e+00 : f32
    %27 = vector.broadcast %cst_23 : f32 to vector<152x128xf32>
    %28 = arith.maximumf %26, %27 : vector<152x128xf32>
    %c0_24 = arith.constant 0 : index
    %c0_25 = arith.constant 0 : index
    %29 = vector.load %arg10[%c0_24, %c0_25] : memref<128x133xf32, #tpu.memory_space<vmem>>, vector<128x133xf32>
    %cst_26 = arith.constant dense<0.000000e+00> : vector<152x133xf32>
    %30 = tpu.matmul %28, %29, %cst_26 {dimension_numbers = #tpu.dot_dimension_numbers<[1], [0], [0], [1], [0, 0, 1, 1], [], []>} : vector<152x128xf32>, vector<128x133xf32>, vector<152x133xf32> -> vector<152x133xf32>
    %c0_27 = arith.constant 0 : index
    %c0_28 = arith.constant 0 : index
    %31 = vector.load %arg11[%c0_27, %c0_28] : memref<1x133xf32, #tpu.memory_space<vmem>>, vector<1x133xf32>
    %32 = vector.broadcast %31 : vector<1x133xf32> to vector<152x133xf32>
    %33 = arith.addf %30, %32 : vector<152x133xf32>
    %c0_29 = arith.constant 0 : index
    %c0_30 = arith.constant 0 : index
    %34 = vector.load %arg12[%c0_29, %c0_30] : memref<152x133xf32, #tpu.memory_space<vmem>>, vector<152x133xf32>
    tpu.vector_store %arg12[%c0_29, %c0_30], %33 {strides = array<i32>} : memref<152x133xf32, #tpu.memory_space<vmem>>, vector<152x133xf32>,
    return
  }
  func.func @transform_0(%arg0: i32) -> (i32, i32) {
    %c0_i32 = arith.constant 0 : i32
    %c0_i32_0 = arith.constant 0 : i32
    return %arg0, %c0_i32 : i32, i32
  }
  func.func @transform_1(%arg0: i32) -> (i32, i32) {
    %c0_i32 = arith.constant 0 : i32
    %c0_i32_0 = arith.constant 0 : i32
    %c0_i32_1 = arith.constant 0 : i32
    return %c0_i32, %c0_i32_0 : i32, i32
  }
  func.func @transform_2(%arg0: i32) -> (i32, i32) {
    %c0_i32 = arith.constant 0 : i32
    %c0_i32_0 = arith.constant 0 : i32
    %c0_i32_1 = arith.constant 0 : i32
    return %c0_i32, %c0_i32_0 : i32, i32
  }
  func.func @transform_3(%arg0: i32) -> (i32, i32) {
    %c0_i32 = arith.constant 0 : i32
    %c0_i32_0 = arith.constant 0 : i32
    %c0_i32_1 = arith.constant 0 : i32
    return %c0_i32, %c0_i32_0 : i32, i32
  }
  func.func @transform_4(%arg0: i32) -> (i32, i32) {
    %c0_i32 = arith.constant 0 : i32
    %c0_i32_0 = arith.constant 0 : i32
    %c0_i32_1 = arith.constant 0 : i32
    return %c0_i32, %c0_i32_0 : i32, i32
  }
  func.func @transform_5(%arg0: i32) -> (i32, i32) {
    %c0_i32 = arith.constant 0 : i32
    %c0_i32_0 = arith.constant 0 : i32
    %c0_i32_1 = arith.constant 0 : i32
    return %c0_i32, %c0_i32_0 : i32, i32
  }
  func.func @transform_6(%arg0: i32) -> (i32, i32) {
    %c0_i32 = arith.constant 0 : i32
    %c0_i32_0 = arith.constant 0 : i32
    %c0_i32_1 = arith.constant 0 : i32
    return %c0_i32, %c0_i32_0 : i32, i32
  }
  func.func @transform_7(%arg0: i32) -> (i32, i32) {
    %c0_i32 = arith.constant 0 : i32
    %c0_i32_0 = arith.constant 0 : i32
    %c0_i32_1 = arith.constant 0 : i32
    return %c0_i32, %c0_i32_0 : i32, i32
  }
  func.func @transform_8(%arg0: i32) -> (i32, i32) {
    %c0_i32 = arith.constant 0 : i32
    %c0_i32_0 = arith.constant 0 : i32
    %c0_i32_1 = arith.constant 0 : i32
    return %c0_i32, %c0_i32_0 : i32, i32
  }
  func.func @transform_9(%arg0: i32) -> (i32, i32) {
    %c0_i32 = arith.constant 0 : i32
    %c0_i32_0 = arith.constant 0 : i32
    %c0_i32_1 = arith.constant 0 : i32
    return %c0_i32, %c0_i32_0 : i32, i32
  }
  func.func @transform_10(%arg0: i32) -> (i32, i32) {
    %c0_i32 = arith.constant 0 : i32
    %c0_i32_0 = arith.constant 0 : i32
    %c0_i32_1 = arith.constant 0 : i32
    return %c0_i32, %c0_i32_0 : i32, i32
  }
  func.func @transform_11(%arg0: i32) -> (i32, i32) {
    %c0_i32 = arith.constant 0 : i32
    %c0_i32_0 = arith.constant 0 : i32
    return %arg0, %c0_i32 : i32, i32
  }
}

</mosaic_0001>

<bundles_post_ra>
// kernel: tpu_custom_call.1
= control target key start
LH: loop header
LB: loop body
LE: loop exit
PB: predicated region body
PF: predicated region fallthrough
CT: control target
= control target key end

     0   :  { %s2021_s17 = smov 0   ;;  %s2937_s0 = inlined_call_operand.vmem [shape: f32[300,40], index: 0, kind: input, shape index: {}]   ;;  %s2938_s1 = inlined_call_operand.vmem [shape: f32[40,128], index: 1, kind: input, shape index: {}]   ;;  %s2939_s2 = inlined_call_operand.vmem [shape: f32[1,128], index: 2, kind: input, shape index: {}]   ;;  %s2940_s3 = inlined_call_operand.vmem [shape: f32[128,256], index: 3, kind: input, shape index: {}]   ;;  %s2941_s4 = inlined_call_operand.vmem [shape: f32[1,256], index: 4, kind: input, shape index: {}]   ;;  %s2942_s5 = inlined_call_operand.vmem [shape: f32[256,128], index: 5, kind: input, shape index: {}]   ;;  %s2943_s6 = inlined_call_operand.vmem [shape: f32[1,128], index: 6, kind: input, shape index: {}]   ;;  %s2944_s7 = inlined_call_operand.vmem [shape: f32[128,128], index: 7, kind: input, shape index: {}]   ;;  %s2945_s8 = inlined_call_operand.vmem [shape: f32[1,128], index: 8, kind: input, shape index: {}]   ;;  %s2946_s9 = inlined_call_operand.vmem [shape: f32[128,133], index: 9, kind: input, shape index: {}]   ;;  %s2947_s10 = inlined_call_operand.vmem [shape: f32[1,133], index: 10, kind: input, shape index: {}]   ;;  %s2948_s11 = inlined_call_operand.vmem [shape: f32[300,133], index: 11, kind: output, shape index: {}]  }
   0x1 LB: > { %s1661_s18 = sadd.s32 4294967295, %s1957_s17   ;;  %p1665_p0 = scmp.ge.s32.totalorder %s1957_s17, 1  ;;  %s1957_s17 = sphi %s2021_s17, %s21_s17  }
   0x2   : > { %p338_p1 = scmp.lt.s32.totalorder %s1957_s17, 3 }
   0x4   : > { %p339_p2 = pnand %p1665_p0, %p338_p1 }
   0x5   : > { %s379_s21 = smul.u32 (!%p339_p2), 19, %s1661_s18 }
   0x6   : > { %342 = sbr.rel (%p339_p2) target bundleno = 1083 (0x43b), region = 64 }
   0x7   : > { %p380_p3 = scmp.lt.s32.totalorder (!%p339_p2), %s379_s21, 37 }
   0xb   : > { %v415_v0 = vld [vmem:[%s2938_s1 + $0x20] sm:$0xff]  ;;  %v1959_v1 = vmov 0.0   ;;  %v414_v2 = vld [vmem:[%s2938_s1 + $0x18] sm:$0xff]  ;;  %vm1960_vm0 = vmmov 0   ;;  %v690_v4 = vld [vmem:[%s2940_s3 + $0xf0] sm:$0xff]  ;;  %s2950_s21 = smov (!%p380_p3, %s379_s21), 37 }
   0xc   : > { %1753 = vmatprep.subr.mxu0 %v1959_v1  ;;  %1763 = vmatprep.mubr.msk.f32.mxu0 %vm1960_vm0, %v1959_v1  ;;  %v691_v3 = vld [vmem:[%s2940_s3 + $0xf8] sm:$0xff]  ;;  %v689_v5 = vld [vmem:[%s2940_s3 + $0xe8] sm:$0xff]  ;;  %v688_v6 = vld [vmem:[%s2940_s3 + $0xe0] sm:$0xff]  ;;  %s1666_s25 = sshll.u32 %s2950_s21, 3  ;;  %vm423_vm1 = vcmask 326656   ;;  %s1693_s14 = sshll.u32 %s2950_s21, 4 }
   0xd   : > { %1754 = vmatpush3.msra.mxu0 %v415_v0  ;;  %704 = vmatprep.subr.mxu1 %v691_v3  ;;  %v413_v7 = vld [vmem:[%s2938_s1 + $0x10] sm:$0xff]  ;;  %v687_v8 = vld [vmem:[%s2940_s3 + $0xd8] sm:$0xff]  ;;  %v412_v10 = vld [vmem:[%s2938_s1 + $0x8] sm:$0xff]  ;;  %s2080_s13 = scalar_lea.vmem %s2937_s0, %s1666_s25  ;;  %s2837_s18 = scalar_lea.vmem %s2948_s11, %s1693_s14  ;;  %vm1565_vm2 = vcmask 39936  }
   0xe   : > { %1755 = vmatprep.subr.mxu0 %v1959_v1  ;;  %705 = vmatpush1.msra.mxu1 %v690_v4  ;;  %v686_v9 = vld [vmem:[%s2940_s3 + $0xd0] sm:$0xff]  ;;  %v685_v11 = vld [vmem:[%s2940_s3 + $0xc8] sm:$0xff]  ;;  %v684_v12 = vld [vmem:[%s2940_s3 + $0xc0] sm:$0xff] }
   0xf   : > { %1756 = vmatpush3.msra.mxu0 %v414_v2  ;;  %706 = vmatprep.subr.mxu1 %v689_v5  ;;  %v411_v13 = vld [vmem:[%s2938_s1] sm:$0xff]  ;;  %v683_v14 = vld [vmem:[%s2940_s3 + $0xb8] sm:$0xff]  ;;  %v682_v16 = vld [vmem:[%s2940_s3 + $0xb0] sm:$0xff] }
  0x10   : > { %1757 = vmatprep.subr.mxu0 %v1959_v1  ;;  %707 = vmatpush1.msra.mxu1 %v688_v6  ;;  %v392_v15 = vld [vmem:[%s2080_s13] sm:$0xff]  ;;  %v681_v17 = vld [vmem:[%s2940_s3 + $0xa8] sm:$0xff]  ;;  %v679_v19 = vld [vmem:[%s2940_s3 + $0x98] sm:$0xff] }
  0x11   : > { %1758 = vmatpush3.msra.mxu0 %v413_v7  ;;  %708 = vmatprep.subr.mxu1 %v687_v8  ;;  %v680_v18 = vld [vmem:[%s2940_s3 + $0xa0] sm:$0xff]  ;;  %v393_v20 = vld [vmem:[%s2080_s13 + $0x8] sm:$0xff]  ;;  %v678_v21 = vld [vmem:[%s2940_s3 + $0x90] sm:$0xff] }
  0x12   : > { %1759 = vmatprep.subr.mxu0 %v1959_v1  ;;  %709 = vmatpush1.msra.mxu1 %v686_v9  ;;  %v677_v22 = vld [vmem:[%s2940_s3 + $0x88] sm:$0xff]  ;;  %v676_v23 = vld [vmem:[%s2940_s3 + $0x80] sm:$0xff]  ;;  %v675_v24 = vld [vmem:[%s2940_s3 + $0x78] sm:$0xff] }
  0x13   : > { %1760 = vmatpush3.msra.mxu0 %v412_v10  ;;  %710 = vmatprep.subr.mxu1 %v685_v11  ;;  %v394_v25 = vld [vmem:[%s2080_s13 + $0x10] sm:$0xff]  ;;  %v673_v27 = vld [vmem:[%s2940_s3 + $0x68] sm:$0xff]  ;;  %v672_v28 = vld [vmem:[%s2940_s3 + $0x60] sm:$0xff] }
  0x14   : > { %1761 = vmatprep.subr.mxu0 %v1959_v1  ;;  %711 = vmatpush1.msra.mxu1 %v684_v12  ;;  %v674_v26 = vld [vmem:[%s2940_s3 + $0x70] sm:$0xff]  ;;  %v671_v29 = vld [vmem:[%s2940_s3 + $0x58] sm:$0xff]  ;;  %v669_v32 = vld [vmem:[%s2940_s3 + $0x48] sm:$0xff] }
  0x15   : > { %1762 = vmatpush3.msra.mxu0 %v411_v13  ;;  %712 = vmatprep.subr.mxu1 %v683_v14  ;;  %v395_v30 = vld [vmem:[%s2080_s13 + $0x18] sm:$0xff]  ;;  %v670_v31 = vld [vmem:[%s2940_s3 + $0x50] sm:$0xff]  ;;  %v668_v33 = vld [vmem:[%s2940_s3 + $0x40] sm:$0xff] }
  0x16   : > { %1764 = vmatmul.mubr.msk.f32.vlgmr.msra.gmra.mxu0 %vm423_vm1, %v392_v15  ;;  %713 = vmatpush1.msra.mxu1 %v682_v16  ;;  %v667_v34 = vld [vmem:[%s2940_s3 + $0x38] sm:$0xff]  ;;  %v396_v35 = vld [vmem:[%s2080_s13 + $0x20] sm:$0xff]  ;;  %v666_v36 = vld [vmem:[%s2940_s3 + $0x30] sm:$0xff] }
  0x17   : > { %1766 = vmatprep.mubr.msk.f32.mxu0 %vm1960_vm0, %v1959_v1  ;;  %714 = vmatprep.subr.mxu1 %v681_v17  ;;  %v665_v37 = vld [vmem:[%s2940_s3 + $0x28] sm:$0xff]  ;;  %v398_v39 = vld [vmem:[%s2080_s13 + $0x30] sm:$0xff]  ;;  %v399_v40 = vld [vmem:[%s2080_s13 + $0x38] sm:$0xff] }
  0x18   : > { %715 = vmatpush1.msra.mxu1 %v680_v18  ;;  %768 = vmatprep.mubr.f32.mxu1 %v1959_v1  ;;  %v397_v38 = vld [vmem:[%s2080_s13 + $0x28] sm:$0xff]  ;;  %v400_v41 = vld [vmem:[%s2080_s13 + $0x40] sm:$0xff]  ;;  %v402_v43 = vld [vmem:[%s2080_s13 + $0x50] sm:$0xff] }
  0x19   : > { %716 = vmatprep.subr.mxu1 %v679_v19  ;;  %960 = vmatprep.subr.mxu0 %v1959_v1  ;;  %v401_v42 = vld [vmem:[%s2080_s13 + $0x48] sm:$0xff]  ;;  %v403_v44 = vld [vmem:[%s2080_s13 + $0x58] sm:$0xff]  ;;  %v404_v45 = vld [vmem:[%s2080_s13 + $0x60] sm:$0xff] }
  0x1a   : > { %1767 = vmatmul.mubr.msk.f32.gmra.mxu0 %vm423_vm1, %v393_v20  ;;  %717 = vmatpush1.msra.mxu1 %v678_v21  ;;  %v405_v46 = vld [vmem:[%s2080_s13 + $0x68] sm:$0xff]  ;;  %v406_v47 = vld [vmem:[%s2080_s13 + $0x70] sm:$0xff]  ;;  %v407_v48 = vld [vmem:[%s2080_s13 + $0x78] sm:$0xff] }
  0x1b   : > { %1769 = vmatprep.mubr.msk.f32.mxu0 %vm1960_vm0, %v1959_v1  ;;  %718 = vmatprep.subr.mxu1 %v677_v22  ;;  %v408_v49 = vld [vmem:[%s2080_s13 + $0x80] sm:$0xff]  ;;  %v663_v51 = vld [vmem:[%s2940_s3 + $0x18] sm:$0xff]  ;;  %v409_v52 = vld [vmem:[%s2080_s13 + $0x88] sm:$0xff] }
  0x1c   : > { %719 = vmatpush1.msra.mxu1 %v676_v23  ;;  %v664_v50 = vld [vmem:[%s2940_s3 + $0x20] sm:$0xff]  ;;  %v662_v53 = vld [vmem:[%s2940_s3 + $0x10] sm:$0xff]  ;;  %v661_v54 = vld [vmem:[%s2940_s3 + $0x8] sm:$0xff] }
  0x1d   : > { %720 = vmatprep.subr.mxu1 %v675_v24  ;;  %v660_v55 = vld [vmem:[%s2940_s3] sm:$0xff]  ;;  %v410_v56 = vld [vmem:[%s2080_s13 + $0x90] sm:$0xff]  ;;  %v936_v57 = vld [vmem:[%s2942_s5 + $0x78] sm:$0xff] }
  0x1e   : > { %1770 = vmatmul.mubr.msk.f32.gmra.mxu0 %vm423_vm1, %v394_v25  ;;  %721 = vmatpush1.msra.mxu1 %v674_v26  ;;  %v935_v58 = vld [vmem:[%s2942_s5 + $0x70] sm:$0xff]  ;;  %v934_v59 = vld [vmem:[%s2942_s5 + $0x68] sm:$0xff]  ;;  %v933_v60 = vld [vmem:[%s2942_s5 + $0x60] sm:$0xff] }
  0x1f   : > { %1772 = vmatprep.mubr.msk.f32.mxu0 %vm1960_vm0, %v1959_v1  ;;  %722 = vmatprep.subr.mxu1 %v673_v27  ;;  %v932_v61 = vld [vmem:[%s2942_s5 + $0x58] sm:$0xff]  ;;  %v931_v62 = vld [vmem:[%s2942_s5 + $0x50] sm:$0xff]  ;;  %v930_v63 = vld [vmem:[%s2942_s5 + $0x48] sm:$0xff] }
  0x20   : > { %723 = vmatpush1.msra.mxu1 %v672_v28  ;;  %961 = vmatpush1.msra.mxu0 %v936_v57  ;;  %v929_v0 = vld [vmem:[%s2942_s5 + $0x40] sm:$0xff]  ;;  %v928_v2 = vld [vmem:[%s2942_s5 + $0x38] sm:$0xff]  ;;  %v927_v3 = vld [vmem:[%s2942_s5 + $0x30] sm:$0xff] }
  0x21   : > { %724 = vmatprep.subr.mxu1 %v671_v29  ;;  %962 = vmatprep.subr.mxu0 %v1959_v1  ;;  %v926_v4 = vld [vmem:[%s2942_s5 + $0x28] sm:$0xff]  ;;  %v925_v5 = vld [vmem:[%s2942_s5 + $0x20] sm:$0xff]  ;;  %v924_v6 = vld [vmem:[%s2942_s5 + $0x18] sm:$0xff] }
  0x22   : > { %1773 = vmatmul.mubr.msk.f32.gmra.mxu0 %vm423_vm1, %v395_v30  ;;  %725 = vmatpush1.msra.mxu1 %v670_v31  ;;  %v923_v7 = vld [vmem:[%s2942_s5 + $0x10] sm:$0xff]  ;;  %v922_v8 = vld [vmem:[%s2942_s5 + $0x8] sm:$0xff]  ;;  %v921_v9 = vld [vmem:[%s2942_s5] sm:$0xff] }
  0x23   : > { %1775 = vmatprep.mubr.msk.f32.mxu0 %vm1960_vm0, %v1959_v1  ;;  %726 = vmatprep.subr.mxu1 %v669_v32  ;;  %v952_v10 = vld [vmem:[%s2942_s5 + $0xf8] sm:$0xff]  ;;  %v951_v11 = vld [vmem:[%s2942_s5 + $0xf0] sm:$0xff]  ;;  %v950_v12 = vld [vmem:[%s2942_s5 + $0xe8] sm:$0xff] }
  0x24   : > { %727 = vmatpush1.msra.mxu1 %v668_v33  ;;  %963 = vmatpush1.msra.mxu0 %v935_v58  ;;  %v949_v13 = vld [vmem:[%s2942_s5 + $0xe0] sm:$0xff]  ;;  %v948_v14 = vld [vmem:[%s2942_s5 + $0xd8] sm:$0xff]  ;;  %v947_v15 = vld [vmem:[%s2942_s5 + $0xd0] sm:$0xff] }
  0x25   : > { %728 = vmatprep.subr.mxu1 %v667_v34  ;;  %964 = vmatprep.subr.mxu0 %v1959_v1  ;;  %v946_v16 = vld [vmem:[%s2942_s5 + $0xc8] sm:$0xff]  ;;  %v945_v17 = vld [vmem:[%s2942_s5 + $0xc0] sm:$0xff]  ;;  %v944_v18 = vld [vmem:[%s2942_s5 + $0xb8] sm:$0xff] }
  0x26   : > { %1776 = vmatmul.mubr.msk.f32.gmra.mxu0 %vm423_vm1, %v396_v35  ;;  %729 = vmatpush1.msra.mxu1 %v666_v36  ;;  %v943_v19 = vld [vmem:[%s2942_s5 + $0xb0] sm:$0xff]  ;;  %v2337_v20 = vld [vmem:[%s2939_s2] ss:$0 sm:$0xff]  ;;  %v942_v21 = vld [vmem:[%s2942_s5 + $0xa8] sm:$0xff] }
  0x27   : > { %1778 = vmatprep.mubr.msk.f32.mxu0 %vm1960_vm0, %v1959_v1  ;;  %730 = vmatprep.subr.mxu1 %v665_v37  ;;  %v941_v24 = vld [vmem:[%s2942_s5 + $0xa0] sm:$0xff]  ;;  %v940_v27 = vld [vmem:[%s2942_s5 + $0x98] sm:$0xff] }
  0x28   : > { %731 = vmatpush1.msra.mxu1 %v664_v50  ;;  %965 = vmatpush1.msra.mxu0 %v934_v59 }
  0x29   : > { %732 = vmatprep.subr.mxu1 %v663_v51  ;;  %966 = vmatprep.subr.mxu0 %v1959_v1 }
  0x2a   : > { %1779 = vmatmul.mubr.msk.f32.gmra.mxu0 %vm423_vm1, %v397_v38  ;;  %733 = vmatpush1.msra.mxu1 %v662_v53 }
  0x2b   : > { %1781 = vmatprep.mubr.msk.f32.mxu0 %vm1960_vm0, %v1959_v1  ;;  %734 = vmatprep.subr.mxu1 %v661_v54 }
  0x2c   : > { %735 = vmatpush1.msra.mxu1 %v660_v55  ;;  %967 = vmatpush1.msra.mxu0 %v933_v60 }
  0x2d   : > { %1820 = vmatprep.subr.mxu1 %v1959_v1  ;;  %968 = vmatprep.subr.mxu0 %v1959_v1 }
  0x2e   : > { %1782 = vmatmul.mubr.msk.f32.gmra.mxu0 %vm423_vm1, %v398_v39 }
  0x2f   : > { %1784 = vmatprep.mubr.msk.f32.mxu0 %vm1960_vm0, %v1959_v1  ;;  %969 = vmatpush1.msra.mxu0 %v932_v61 }
  0x30   : > { %970 = vmatprep.subr.mxu0 %v1959_v1 }
  0x31   : > { %971 = vmatpush1.msra.mxu0 %v931_v62 }
  0x32   : > { %1785 = vmatmul.mubr.msk.f32.gmra.mxu0 %vm423_vm1, %v399_v40  ;;  %972 = vmatprep.subr.mxu0 %v1959_v1 }
  0x33   : > { %1787 = vmatprep.mubr.msk.f32.mxu0 %vm1960_vm0, %v1959_v1  ;;  %973 = vmatpush1.msra.mxu0 %v930_v63 }
  0x34   : > { %974 = vmatprep.subr.mxu0 %v1959_v1 }
  0x35   : > { %975 = vmatpush1.msra.mxu0 %v929_v0 }
  0x36   : > { %1788 = vmatmul.mubr.msk.f32.gmra.mxu0 %vm423_vm1, %v400_v41  ;;  %976 = vmatprep.subr.mxu0 %v1959_v1 }
  0x37   : > { %1790 = vmatprep.mubr.msk.f32.mxu0 %vm1960_vm0, %v1959_v1  ;;  %977 = vmatpush1.msra.mxu0 %v928_v2 }
  0x38   : > { %978 = vmatprep.subr.mxu0 %v1959_v1 }
  0x39   : > { %979 = vmatpush1.msra.mxu0 %v927_v3 }
  0x3a   : > { %1791 = vmatmul.mubr.msk.f32.gmra.mxu0 %vm423_vm1, %v401_v42  ;;  %980 = vmatprep.subr.mxu0 %v1959_v1 }
  0x3b   : > { %1793 = vmatprep.mubr.msk.f32.mxu0 %vm1960_vm0, %v1959_v1  ;;  %981 = vmatpush1.msra.mxu0 %v926_v4 }
  0x3c   : > { %982 = vmatprep.subr.mxu0 %v1959_v1 }
  0x3d   : > { %983 = vmatpush1.msra.mxu0 %v925_v5 }
  0x3e   : > { %1794 = vmatmul.mubr.msk.f32.gmra.mxu0 %vm423_vm1, %v402_v43  ;;  %984 = vmatprep.subr.mxu0 %v1959_v1 }
  0x3f   : > { %1796 = vmatprep.mubr.msk.f32.mxu0 %vm1960_vm0, %v1959_v1  ;;  %985 = vmatpush1.msra.mxu0 %v924_v6 }
  0x40   : > { %986 = vmatprep.subr.mxu0 %v1959_v1 }
  0x41   : > { %987 = vmatpush1.msra.mxu0 %v923_v7 }
  0x42   : > { %1797 = vmatmul.mubr.msk.f32.gmra.mxu0 %vm423_vm1, %v403_v44  ;;  %988 = vmatprep.subr.mxu0 %v1959_v1 }
  0x43   : > { %1799 = vmatprep.mubr.msk.f32.mxu0 %vm1960_vm0, %v1959_v1  ;;  %989 = vmatpush1.msra.mxu0 %v922_v8 }
  0x44   : > { %990 = vmatprep.subr.mxu0 %v1959_v1 }
  0x45   : > { %991 = vmatpush1.msra.mxu0 %v921_v9 }
  0x46   : > { %1800 = vmatmul.mubr.msk.f32.gmra.mxu0 %vm423_vm1, %v404_v45  ;;  %992 = vmatprep.subr.mxu0 %v1959_v1 }
  0x47   : > { %1802 = vmatprep.mubr.msk.f32.mxu0 %vm1960_vm0, %v1959_v1  ;;  %993 = vmatpush2.msra.mxu0 %v952_v10 }
  0x48   : > { %994 = vmatprep.subr.mxu0 %v1959_v1 }
  0x49   : > { %995 = vmatpush2.msra.mxu0 %v951_v11 }
  0x4a   : > { %1803 = vmatmul.mubr.msk.f32.gmra.mxu0 %vm423_vm1, %v405_v46  ;;  %996 = vmatprep.subr.mxu0 %v1959_v1 }
  0x4b   : > { %1805 = vmatprep.mubr.msk.f32.mxu0 %vm1960_vm0, %v1959_v1  ;;  %997 = vmatpush2.msra.mxu0 %v950_v12 }
  0x4c   : > { %998 = vmatprep.subr.mxu0 %v1959_v1 }
  0x4d   : > { %999 = vmatpush2.msra.mxu0 %v949_v13 }
  0x4e   : > { %1806 = vmatmul.mubr.msk.f32.gmra.mxu0 %vm423_vm1, %v406_v47  ;;  %1000 = vmatprep.subr.mxu0 %v1959_v1 }
  0x4f   : > { %1808 = vmatprep.mubr.msk.f32.mxu0 %vm1960_vm0, %v1959_v1  ;;  %1001 = vmatpush2.msra.mxu0 %v948_v14 }
  0x50   : > { %1002 = vmatprep.subr.mxu0 %v1959_v1 }
  0x51   : > { %1003 = vmatpush2.msra.mxu0 %v947_v15 }
  0x52   : > { %1809 = vmatmul.mubr.msk.f32.gmra.mxu0 %vm423_vm1, %v407_v48  ;;  %1004 = vmatprep.subr.mxu0 %v1959_v1 }
  0x53   : > { %1811 = vmatprep.mubr.msk.f32.mxu0 %vm1960_vm0, %v1959_v1  ;;  %1005 = vmatpush2.msra.mxu0 %v946_v16 }
  0x54   : > { %1006 = vmatprep.subr.mxu0 %v1959_v1 }
  0x55   : > { %1007 = vmatpush2.msra.mxu0 %v945_v17 }
  0x56   : > { %1812 = vmatmul.mubr.msk.f32.gmra.mxu0 %vm423_vm1, %v408_v49  ;;  %1008 = vmatprep.subr.mxu0 %v1959_v1 }
  0x57   : > { %1814 = vmatprep.mubr.msk.f32.mxu0 %vm1960_vm0, %v1959_v1  ;;  %1009 = vmatpush2.msra.mxu0 %v944_v18 }
  0x58   : > { %1010 = vmatprep.subr.mxu0 %v1959_v1 }
  0x59   : > { %1011 = vmatpush2.msra.mxu0 %v943_v19 }
  0x5a   : > { %1815 = vmatmul.mubr.msk.f32.gmra.mxu0 %vm423_vm1, %v409_v52  ;;  %1012 = vmatprep.subr.mxu0 %v1959_v1 }
  0x5b   : > { %1817 = vmatprep.mubr.msk.f32.mxu0 %vm1960_vm0, %v1959_v1  ;;  %1013 = vmatpush2.msra.mxu0 %v942_v21 }
  0x5c   : > { %1014 = vmatprep.subr.mxu0 %v1959_v1 }
  0x5d   : > { %1015 = vmatpush2.msra.mxu0 %v941_v24 }
  0x5e   : > { %1818 = vmatmul.mubr.msk.f32.gmra.mxu0 %vm423_vm1, %v410_v56  ;;  %1016 = vmatprep.subr.mxu0 %v1959_v1 }
  0x5f   : > { %1017 = vmatpush2.msra.mxu0 %v940_v27 }
  0x60   : > { %1018 = vmatprep.subr.mxu0 %v1959_v1 }
  0xd6   : > { %v547_v22 = vpop.f32.mrf.mxu0 }
  0xd7   : > { %v548_v23 = vadd.f32 %v2337_v20, %v547_v22 }
  0xd8   : > { %v1765_v25 = vpop.f32.mrf.mxu0 }
  0xd9   : > { %v641_v26 = vmax.f32 %v548_v23, 0.0 }
  0xda   : > { %v552_v28 = vpop.f32.mrf.mxu0 }
  0xdb   : > { %v553_v29 = vadd.f32 %v2337_v20, %v552_v28  ;;  %769 = vmatmul.mubr.f32.vlgmr.msra.gmra.mxu1 %v641_v26 }
  0xdc   : > { %v1768_v30 = vpop.f32.mrf.mxu0  ;;  %774 = vmatprep.mubr.f32.mxu1 %v1959_v1 }
  0xdd   : > { %v642_v31 = vmax.f32 %v553_v29, 0.0 }
  0xde   : > { %v557_v32 = vpop.f32.mrf.mxu0 }
  0xdf   : > { %v558_v33 = vadd.f32 %v2337_v20, %v557_v32  ;;  %775 = vmatmul.mubr.f32.gmra.mxu1 %v642_v31 }
  0xe0   : > { %v1771_v34 = vpop.f32.mrf.mxu0  ;;  %780 = vmatprep.mubr.f32.mxu1 %v1959_v1 }
  0xe1   : > { %v643_v35 = vmax.f32 %v558_v33, 0.0  ;;  %v939_v34 = vld [vmem:[%s2942_s5 + $0x90] sm:$0xff] }
  0xe2   : > { %v562_v36 = vpop.f32.mrf.mxu0  ;;  %1019 = vmatpush2.msra.mxu0 %v939_v34 }
  0xe3   : > { %v563_v37 = vadd.f32 %v2337_v20, %v562_v36  ;;  %781 = vmatmul.mubr.f32.gmra.mxu1 %v643_v35  ;;  %1020 = vmatprep.subr.mxu0 %v1959_v1 }
  0xe4   : > { %v1774_v38 = vpop.f32.mrf.mxu0  ;;  %786 = vmatprep.mubr.f32.mxu1 %v1959_v1 }
  0xe5   : > { %v644_v39 = vmax.f32 %v563_v37, 0.0  ;;  %v938_v37 = vld [vmem:[%s2942_s5 + $0x88] sm:$0xff] }
  0xe6   : > { %v567_v40 = vpop.f32.mrf.mxu0  ;;  %1021 = vmatpush2.msra.mxu0 %v938_v37 }
  0xe7   : > { %v568_v41 = vadd.f32 %v2337_v20, %v567_v40  ;;  %787 = vmatmul.mubr.f32.gmra.mxu1 %v644_v39  ;;  %1022 = vmatprep.subr.mxu0 %v1959_v1  ;;  %v937_v40 = vld [vmem:[%s2942_s5 + $0x80] sm:$0xff] }
  0xe8   : > { %v1777_v42 = vpop.f32.mrf.mxu0  ;;  %792 = vmatprep.mubr.f32.mxu1 %v1959_v1  ;;  %1023 = vmatpush2.msra.mxu0 %v937_v40 }
  0xe9   : > { %v645_v43 = vmax.f32 %v568_v41, 0.0  ;;  %v1153_v41 = vld [vmem:[%s2944_s7 + $0x70] sm:$0xff]  ;;  %v1152_v42 = vld [vmem:[%s2944_s7 + $0x68] sm:$0xff] }
  0xea   : > { %v572_v44 = vpop.f32.mrf.mxu0 }
  0xeb   : > { %v573_v45 = vadd.f32 %v2337_v20, %v572_v44  ;;  %793 = vmatmul.mubr.f32.gmra.mxu1 %v645_v43  ;;  %v1151_v43 = vld [vmem:[%s2944_s7 + $0x60] sm:$0xff]  ;;  %v1150_v44 = vld [vmem:[%s2944_s7 + $0x58] sm:$0xff] }
  0xec   : > { %v1780_v46 = vpop.f32.mrf.mxu0  ;;  %798 = vmatprep.mubr.f32.mxu1 %v1959_v1 }
  0xed   : > { %v646_v47 = vmax.f32 %v573_v45, 0.0  ;;  %v1149_v45 = vld [vmem:[%s2944_s7 + $0x50] sm:$0xff]  ;;  %v1148_v46 = vld [vmem:[%s2944_s7 + $0x48] sm:$0xff] }
  0xee   : > { %v577_v48 = vpop.f32.mrf.mxu0 }
  0xef   : > { %v578_v49 = vadd.f32 %v2337_v20, %v577_v48  ;;  %799 = vmatmul.mubr.f32.gmra.mxu1 %v646_v47  ;;  %v1147_v47 = vld [vmem:[%s2944_s7 + $0x40] sm:$0xff]  ;;  %v1146_v48 = vld [vmem:[%s2944_s7 + $0x38] sm:$0xff] }
  0xf0   : > { %v1783_v50 = vpop.f32.mrf.mxu0  ;;  %804 = vmatprep.mubr.f32.mxu1 %v1959_v1 }
  0xf1   : > { %v647_v51 = vmax.f32 %v578_v49, 0.0  ;;  %v1145_v49 = vld [vmem:[%s2944_s7 + $0x30] sm:$0xff]  ;;  %v1144_v50 = vld [vmem:[%s2944_s7 + $0x28] sm:$0xff] }
  0xf2   : > { %v582_v52 = vpop.f32.mrf.mxu0 }
  0xf3   : > { %v583_v53 = vadd.f32 %v2337_v20, %v582_v52  ;;  %805 = vmatmul.mubr.f32.gmra.mxu1 %v647_v51  ;;  %v1143_v51 = vld [vmem:[%s2944_s7 + $0x20] sm:$0xff]  ;;  %v1142_v52 = vld [vmem:[%s2944_s7 + $0x18] sm:$0xff] }
  0xf4   : > { %v1786_v54 = vpop.f32.mrf.mxu0  ;;  %810 = vmatprep.mubr.f32.mxu1 %v1959_v1 }
  0xf5   : > { %v648_v55 = vmax.f32 %v583_v53, 0.0  ;;  %v1141_v53 = vld [vmem:[%s2944_s7 + $0x10] sm:$0xff]  ;;  %v1140_v54 = vld [vmem:[%s2944_s7 + $0x8] sm:$0xff] }
  0xf6   : > { %v587_v56 = vpop.f32.mrf.mxu0 }
  0xf7   : > { %v588_v57 = vadd.f32 %v2337_v20, %v587_v56  ;;  %811 = vmatmul.mubr.f32.gmra.mxu1 %v648_v55  ;;  %v694_v55 = vlaneseq }
  0xf8   : > { %v1789_v58 = vpop.f32.mrf.mxu0  ;;  %816 = vmatprep.mubr.f32.mxu1 %v1959_v1 }
  0xf9   : > { %v649_v59 = vmax.f32 %v588_v57, 0.0  ;;  %v2463_v56 = vshrl.u32 %v694_v55, 7  ;;  %v692_v58 = vld [vmem:[%s2941_s4] sm:$0x3] }
  0xfa   : > { %v592_v60 = vpop.f32.mrf.mxu0 }
  0xfb   : > { %v593_v61 = vadd.f32 %v2337_v20, %v592_v60  ;;  %817 = vmatmul.mubr.f32.gmra.mxu1 %v649_v59  ;;  %v696_v57 = vsub.s32 0, %v2463_v56  ;;  %v700_v59 = vsub.s32 1, %v2463_v56 }
  0xfc   : > { %v1792_v62 = vpop.f32.mrf.mxu0  ;;  %822 = vmatprep.mubr.f32.mxu1 %v1959_v1 }
  0xfd   : > { %v650_v63 = vmax.f32 %v593_v61, 0.0  ;;  %v2472_v60 = vrot.slane %v692_v58, %v696_v57  ;;  %v2476_v61 = vrot.slane %v692_v58, %v700_v59 }
  0xfe   : > { %v597_v0 = vpop.f32.mrf.mxu0 }
  0xff   : > { %v598_v2 = vadd.f32 %v2337_v20, %v597_v0  ;;  %823 = vmatmul.mubr.f32.gmra.mxu1 %v650_v63 }
 0x100   : > { %v1795_v3 = vpop.f32.mrf.mxu0  ;;  %828 = vmatprep.mubr.f32.mxu1 %v1959_v1 }
 0x101   : > { %v651_v4 = vmax.f32 %v598_v2, 0.0 }
 0x102   : > { %v602_v5 = vpop.f32.mrf.mxu0 }
 0x103   : > { %v603_v6 = vadd.f32 %v2337_v20, %v602_v5  ;;  %829 = vmatmul.mubr.f32.gmra.mxu1 %v651_v4 }
 0x104   : > { %v1798_v7 = vpop.f32.mrf.mxu0  ;;  %834 = vmatprep.mubr.f32.mxu1 %v1959_v1 }
 0x105   : > { %v652_v8 = vmax.f32 %v603_v6, 0.0 }
 0x106   : > { %v607_v9 = vpop.f32.mrf.mxu0 }
 0x107   : > { %v608_v10 = vadd.f32 %v2337_v20, %v607_v9  ;;  %835 = vmatmul.mubr.f32.gmra.mxu1 %v652_v8 }
 0x108   : > { %v1801_v11 = vpop.f32.mrf.mxu0  ;;  %840 = vmatprep.mubr.f32.mxu1 %v1959_v1 }
 0x109   : > { %v653_v12 = vmax.f32 %v608_v10, 0.0 }
 0x10a   : > { %v612_v13 = vpop.f32.mrf.mxu0 }
 0x10b   : > { %v613_v14 = vadd.f32 %v2337_v20, %v612_v13  ;;  %841 = vmatmul.mubr.f32.gmra.mxu1 %v653_v12 }
 0x10c   : > { %v1804_v15 = vpop.f32.mrf.mxu0  ;;  %846 = vmatprep.mubr.f32.mxu1 %v1959_v1 }
 0x10d   : > { %v654_v16 = vmax.f32 %v613_v14, 0.0 }
 0x10e   : > { %v617_v17 = vpop.f32.mrf.mxu0 }
 0x10f   : > { %v618_v18 = vadd.f32 %v2337_v20, %v617_v17  ;;  %847 = vmatmul.mubr.f32.gmra.mxu1 %v654_v16 }
 0x110   : > { %v1807_v19 = vpop.f32.mrf.mxu0  ;;  %852 = vmatprep.mubr.f32.mxu1 %v1959_v1 }
 0x111   : > { %v655_v21 = vmax.f32 %v618_v18, 0.0 }
 0x112   : > { %v622_v22 = vpop.f32.mrf.mxu0 }
 0x113   : > { %v623_v23 = vadd.f32 %v2337_v20, %v622_v22  ;;  %853 = vmatmul.mubr.f32.gmra.mxu1 %v655_v21 }
 0x114   : > { %v1810_v24 = vpop.f32.mrf.mxu0  ;;  %858 = vmatprep.mubr.f32.mxu1 %v1959_v1 }
 0x115   : > { %v656_v25 = vmax.f32 %v623_v23, 0.0 }
 0x116   : > { %v627_v26 = vpop.f32.mrf.mxu0 }
 0x117   : > { %v628_v27 = vadd.f32 %v2337_v20, %v627_v26  ;;  %859 = vmatmul.mubr.f32.gmra.mxu1 %v656_v25 }
 0x118   : > { %v1813_v28 = vpop.f32.mrf.mxu0  ;;  %864 = vmatprep.mubr.f32.mxu1 %v1959_v1 }
 0x119   : > { %v657_v29 = vmax.f32 %v628_v27, 0.0 }
 0x11a   : > { %v632_v30 = vpop.f32.mrf.mxu0 }
 0x11b   : > { %v633_v31 = vadd.f32 %v2337_v20, %v632_v30  ;;  %865 = vmatmul.mubr.f32.gmra.mxu1 %v657_v29 }
 0x11c   : > { %v1816_v32 = vpop.f32.mrf.mxu0  ;;  %870 = vmatprep.mubr.f32.mxu1 %v1959_v1 }
 0x11d   : > { %v658_v33 = vmax.f32 %v633_v31, 0.0 }
 0x11e   : > { %v637_v35 = vpop.f32.mrf.mxu0 }
 0x11f   : > { %v638_v36 = vadd.f32 %v2337_v20, %v637_v35  ;;  %871 = vmatmul.mubr.f32.gmra.mxu1 %v658_v33  ;;  %v1154_v20 = vld [vmem:[%s2944_s7 + $0x78] sm:$0xff] }
 0x120   : > { %v1819_v38 = vpop.f32.mrf.mxu0  ;;  %876 = vmatprep.mubr.f32.mxu1 %v1959_v1  ;;  %1821 = vmatpush3.msra.mxu1 %v1154_v20 }
 0x121   : > { %v659_v39 = vmax.f32 %v638_v36, 0.0  ;;  %1822 = vmatprep.subr.mxu1 %v1959_v1 }
 0x122   : > { %1823 = vmatpush3.msra.mxu1 %v1153_v41 }
 0x123   : > { %877 = vmatmul.mubr.f32.gmra.mxu1 %v659_v39  ;;  %1824 = vmatprep.subr.mxu1 %v1959_v1 }
 0x124   : > { %1852 = vmatprep.mubr.msk.f32.mxu1 %vm1960_vm0, %v1959_v1  ;;  %1825 = vmatpush3.msra.mxu1 %v1152_v42 }
 0x125   : > { %1826 = vmatprep.subr.mxu1 %v1959_v1 }
 0x126   : > { %1827 = vmatpush3.msra.mxu1 %v1151_v43 }
 0x127   : > { %1828 = vmatprep.subr.mxu1 %v1959_v1 }
 0x128   : > { %1829 = vmatpush3.msra.mxu1 %v1150_v44 }
 0x129   : > { %1830 = vmatprep.subr.mxu1 %v1959_v1 }
 0x12a   : > { %1831 = vmatpush3.msra.mxu1 %v1149_v45 }
 0x12b   : > { %1832 = vmatprep.subr.mxu1 %v1959_v1 }
 0x12c   : > { %1833 = vmatpush3.msra.mxu1 %v1148_v46 }
 0x12d   : > { %1834 = vmatprep.subr.mxu1 %v1959_v1 }
 0x12e   : > { %1835 = vmatpush3.msra.mxu1 %v1147_v47 }
 0x12f   : > { %1836 = vmatprep.subr.mxu1 %v1959_v1 }
 0x130   : > { %1837 = vmatpush3.msra.mxu1 %v1146_v48 }
 0x131   : > { %1838 = vmatprep.subr.mxu1 %v1959_v1 }
 0x132   : > { %1839 = vmatpush3.msra.mxu1 %v1145_v49 }
 0x133   : > { %1840 = vmatprep.subr.mxu1 %v1959_v1 }
 0x134   : > { %1841 = vmatpush3.msra.mxu1 %v1144_v50 }
 0x135   : > { %1842 = vmatprep.subr.mxu1 %v1959_v1 }
 0x136   : > { %1843 = vmatpush3.msra.mxu1 %v1143_v51 }
 0x137   : > { %1844 = vmatprep.subr.mxu1 %v1959_v1 }
 0x138   : > { %1845 = vmatpush3.msra.mxu1 %v1142_v52 }
 0x139   : > { %1846 = vmatprep.subr.mxu1 %v1959_v1 }
 0x13a   : > { %1847 = vmatpush3.msra.mxu1 %v1141_v53 }
 0x13b   : > { %1848 = vmatprep.subr.mxu1 %v1959_v1 }
 0x13c   : > { %1849 = vmatpush3.msra.mxu1 %v1140_v54 }
 0x13d   : > { %1850 = vmatprep.subr.mxu1 %v1959_v1 }
 0x19b   : > { %v770_v62 = vpop.f32.mrf.mxu1 }
 0x19c   : > { %v771_v63 = vadd.f32 %v770_v62, %v2472_v60 }
 0x19d   : > { %v772_v0 = vpop.f32.mrf.mxu1 }
 0x19e   : > { %v773_v2 = vadd.f32 %v772_v0, %v2476_v61  ;;  %v883_v5 = vmax.f32 %v771_v63, 0.0 }
 0x19f   : > { %v776_v3 = vpop.f32.mrf.mxu1 }
 0x1a0   : > { %v884_v4 = vmax.f32 %v773_v2, 0.0  ;;  %v777_v6 = vadd.f32 %v776_v3, %v2472_v60 }
 0x1a1   : > { %v778_v7 = vpop.f32.mrf.mxu1 }
 0x1a2   : > { %v779_v8 = vadd.f32 %v778_v7, %v2476_v61  ;;  %1024 = vmatprep.mubr.f32.mxu0 %v884_v4  ;;  %v885_v11 = vmax.f32 %v777_v6, 0.0 }
 0x1a3   : > { %v782_v9 = vpop.f32.mrf.mxu1  ;;  %1025 = vmatmul.mubr.f32.vlgmr.msra.gmra.mxu0 %v883_v5 }
 0x1a4   : > { %v886_v10 = vmax.f32 %v779_v8, 0.0  ;;  %v783_v12 = vadd.f32 %v782_v9, %v2472_v60 }
 0x1a5   : > { %v784_v13 = vpop.f32.mrf.mxu1 }
 0x1a6   : > { %v785_v14 = vadd.f32 %v784_v13, %v2476_v61  ;;  %1029 = vmatprep.mubr.f32.mxu0 %v886_v10  ;;  %v887_v17 = vmax.f32 %v783_v12, 0.0 }
 0x1a7   : > { %v788_v15 = vpop.f32.mrf.mxu1  ;;  %1030 = vmatmul.mubr.f32.gmra.mxu0 %v885_v11 }
 0x1a8   : > { %v888_v16 = vmax.f32 %v785_v14, 0.0  ;;  %v789_v18 = vadd.f32 %v788_v15, %v2472_v60 }
 0x1a9   : > { %v790_v19 = vpop.f32.mrf.mxu1 }
 0x1aa   : > { %v791_v21 = vadd.f32 %v790_v19, %v2476_v61  ;;  %1034 = vmatprep.mubr.f32.mxu0 %v888_v16  ;;  %v889_v24 = vmax.f32 %v789_v18, 0.0 }
 0x1ab   : > { %v794_v22 = vpop.f32.mrf.mxu1  ;;  %1035 = vmatmul.mubr.f32.gmra.mxu0 %v887_v17 }
 0x1ac   : > { %v890_v23 = vmax.f32 %v791_v21, 0.0  ;;  %v795_v25 = vadd.f32 %v794_v22, %v2472_v60 }
 0x1ad   : > { %v796_v26 = vpop.f32.mrf.mxu1 }
 0x1ae   : > { %v797_v27 = vadd.f32 %v796_v26, %v2476_v61  ;;  %1039 = vmatprep.mubr.f32.mxu0 %v890_v23  ;;  %v891_v30 = vmax.f32 %v795_v25, 0.0 }
 0x1af   : > { %v800_v28 = vpop.f32.mrf.mxu1  ;;  %1040 = vmatmul.mubr.f32.gmra.mxu0 %v889_v24 }
 0x1b0   : > { %v892_v29 = vmax.f32 %v797_v27, 0.0  ;;  %v801_v31 = vadd.f32 %v800_v28, %v2472_v60 }
 0x1b1   : > { %v802_v32 = vpop.f32.mrf.mxu1 }
 0x1b2   : > { %v803_v33 = vadd.f32 %v802_v32, %v2476_v61  ;;  %1044 = vmatprep.mubr.f32.mxu0 %v892_v29  ;;  %v893_v36 = vmax.f32 %v801_v31, 0.0 }
 0x1b3   : > { %v806_v34 = vpop.f32.mrf.mxu1  ;;  %1045 = vmatmul.mubr.f32.gmra.mxu0 %v891_v30 }
 0x1b4   : > { %v894_v35 = vmax.f32 %v803_v33, 0.0  ;;  %v807_v37 = vadd.f32 %v806_v34, %v2472_v60 }
 0x1b5   : > { %v808_v38 = vpop.f32.mrf.mxu1 }
 0x1b6   : > { %v809_v39 = vadd.f32 %v808_v38, %v2476_v61  ;;  %1049 = vmatprep.mubr.f32.mxu0 %v894_v35  ;;  %v895_v41 = vmax.f32 %v807_v37, 0.0 }
 0x1b7   : > { %v812_v40 = vpop.f32.mrf.mxu1  ;;  %1050 = vmatmul.mubr.f32.gmra.mxu0 %v893_v36 }
 0x1b8   : > { %v896_v20 = vmax.f32 %v809_v39, 0.0  ;;  %v813_v42 = vadd.f32 %v812_v40, %v2472_v60 }
 0x1b9   : > { %v814_v43 = vpop.f32.mrf.mxu1 }
 0x1ba   : > { %v815_v44 = vadd.f32 %v814_v43, %v2476_v61  ;;  %1054 = vmatprep.mubr.f32.mxu0 %v896_v20  ;;  %v897_v47 = vmax.f32 %v813_v42, 0.0 }
 0x1bb   : > { %v818_v45 = vpop.f32.mrf.mxu1  ;;  %1055 = vmatmul.mubr.f32.gmra.mxu0 %v895_v41 }
 0x1bc   : > { %v898_v46 = vmax.f32 %v815_v44, 0.0  ;;  %v819_v48 = vadd.f32 %v818_v45, %v2472_v60 }
 0x1bd   : > { %v820_v49 = vpop.f32.mrf.mxu1 }
 0x1be   : > { %v821_v50 = vadd.f32 %v820_v49, %v2476_v61  ;;  %1059 = vmatprep.mubr.f32.mxu0 %v898_v46  ;;  %v899_v53 = vmax.f32 %v819_v48, 0.0 }
 0x1bf   : > { %v824_v51 = vpop.f32.mrf.mxu1  ;;  %1060 = vmatmul.mubr.f32.gmra.mxu0 %v897_v47 }
 0x1c0   : > { %v900_v52 = vmax.f32 %v821_v50, 0.0  ;;  %v825_v54 = vadd.f32 %v824_v51, %v2472_v60 }
 0x1c1   : > { %v826_v55 = vpop.f32.mrf.mxu1 }
 0x1c2   : > { %v827_v58 = vadd.f32 %v826_v55, %v2476_v61  ;;  %1064 = vmatprep.mubr.f32.mxu0 %v900_v52  ;;  %v901_v0 = vmax.f32 %v825_v54, 0.0 }
 0x1c3   : > { %v830_v62 = vpop.f32.mrf.mxu1  ;;  %1065 = vmatmul.mubr.f32.gmra.mxu0 %v899_v53  ;;  %v1139_v53 = vld [vmem:[%s2944_s7] sm:$0xff] }
 0x1c4   : > { %v902_v63 = vmax.f32 %v827_v58, 0.0  ;;  %v831_v2 = vadd.f32 %v830_v62, %v2472_v60  ;;  %1851 = vmatpush3.msra.mxu1 %v1139_v53  ;;  %v2531_v58 = vld [vmem:[%s2946_s9 + $0xe8] sm:$0xff]  ;;  %v2536_v62 = vld [vmem:[%s2946_s9 + $0xe0] sm:$0xff] }
 0x1c5   : > { %v832_v3 = vpop.f32.mrf.mxu1 }
 0x1c6   : > { %v833_v4 = vadd.f32 %v832_v3, %v2476_v61  ;;  %1069 = vmatprep.mubr.f32.mxu0 %v902_v63  ;;  %v903_v7 = vmax.f32 %v831_v2, 0.0  ;;  %v2542_v63 = vld [vmem:[%s2946_s9 + $0xd8] sm:$0xff]  ;;  %v2554_v2 = vld [vmem:[%s2946_s9 + $0xc8] sm:$0xff]  ;;  %v2560_v3 = vld [vmem:[%s2946_s9 + $0xc0] sm:$0xff] }
 0x1c7   : > { %v836_v5 = vpop.f32.mrf.mxu1  ;;  %1070 = vmatmul.mubr.f32.gmra.mxu0 %v901_v0  ;;  %v2548_v0 = vld [vmem:[%s2946_s9 + $0xd0] sm:$0xff] }
 0x1c8   : > { %v904_v6 = vmax.f32 %v833_v4, 0.0  ;;  %v837_v8 = vadd.f32 %v836_v5, %v2472_v60  ;;  %v2566_v4 = vld [vmem:[%s2946_s9 + $0xb8] sm:$0xff]  ;;  %v2572_v5 = vld [vmem:[%s2946_s9 + $0xb0] sm:$0xff] }
 0x1c9   : > { %v838_v9 = vpop.f32.mrf.mxu1 }
 0x1ca   : > { %v839_v10 = vadd.f32 %v838_v9, %v2476_v61  ;;  %1074 = vmatprep.mubr.f32.mxu0 %v904_v6  ;;  %v905_v13 = vmax.f32 %v837_v8, 0.0  ;;  %v2578_v6 = vld [vmem:[%s2946_s9 + $0xa8] sm:$0xff]  ;;  %v2590_v8 = vld [vmem:[%s2946_s9 + $0x98] sm:$0xff]  ;;  %v2596_v9 = vld [vmem:[%s2946_s9 + $0x90] sm:$0xff] }
 0x1cb   : > { %v842_v11 = vpop.f32.mrf.mxu1  ;;  %1075 = vmatmul.mubr.f32.gmra.mxu0 %v903_v7  ;;  %v2584_v7 = vld [vmem:[%s2946_s9 + $0xa0] sm:$0xff] }
 0x1cc   : > { %v906_v12 = vmax.f32 %v839_v10, 0.0  ;;  %v843_v14 = vadd.f32 %v842_v11, %v2472_v60  ;;  %v2602_v10 = vld [vmem:[%s2946_s9 + $0x88] sm:$0xff]  ;;  %v2608_v11 = vld [vmem:[%s2946_s9 + $0x80] sm:$0xff] }
 0x1cd   : > { %v844_v15 = vpop.f32.mrf.mxu1 }
 0x1ce   : > { %v845_v16 = vadd.f32 %v844_v15, %v2476_v61  ;;  %1079 = vmatprep.mubr.f32.mxu0 %v906_v12  ;;  %v907_v19 = vmax.f32 %v843_v14, 0.0  ;;  %v2614_v12 = vld [vmem:[%s2946_s9 + $0x78] sm:$0xff]  ;;  %v2626_v14 = vld [vmem:[%s2946_s9 + $0x68] sm:$0xff]  ;;  %v2632_v15 = vld [vmem:[%s2946_s9 + $0x60] sm:$0xff] }
 0x1cf   : > { %v848_v17 = vpop.f32.mrf.mxu1  ;;  %1080 = vmatmul.mubr.f32.gmra.mxu0 %v905_v13  ;;  %v2620_v13 = vld [vmem:[%s2946_s9 + $0x70] sm:$0xff] }
 0x1d0   : > { %v908_v18 = vmax.f32 %v845_v16, 0.0  ;;  %v849_v21 = vadd.f32 %v848_v17, %v2472_v60  ;;  %v2638_v16 = vld [vmem:[%s2946_s9 + $0x58] sm:$0xff]  ;;  %v2644_v17 = vld [vmem:[%s2946_s9 + $0x50] sm:$0xff] }
 0x1d1   : > { %v850_v22 = vpop.f32.mrf.mxu1 }
 0x1d2   : > { %v851_v23 = vadd.f32 %v850_v22, %v2476_v61  ;;  %1084 = vmatprep.mubr.f32.mxu0 %v908_v18  ;;  %v909_v26 = vmax.f32 %v849_v21, 0.0  ;;  %v2650_v18 = vld [vmem:[%s2946_s9 + $0x48] sm:$0xff]  ;;  %v2662_v21 = vld [vmem:[%s2946_s9 + $0x38] sm:$0xff]  ;;  %v2668_v22 = vld [vmem:[%s2946_s9 + $0x30] sm:$0xff] }
 0x1d3   : > { %v854_v24 = vpop.f32.mrf.mxu1  ;;  %1085 = vmatmul.mubr.f32.gmra.mxu0 %v907_v19  ;;  %v2656_v19 = vld [vmem:[%s2946_s9 + $0x40] sm:$0xff] }
 0x1d4   : > { %v910_v25 = vmax.f32 %v851_v23, 0.0  ;;  %v855_v27 = vadd.f32 %v854_v24, %v2472_v60  ;;  %v2674_v23 = vld [vmem:[%s2946_s9 + $0x28] sm:$0xff]  ;;  %v2682_v24 = vld [vmem:[%s2943_s6] ss:$0 sm:$0xff] }
 0x1d5   : > { %v856_v28 = vpop.f32.mrf.mxu1 }
 0x1d6   : > { %v857_v29 = vadd.f32 %v856_v28, %v2476_v61  ;;  %1089 = vmatprep.mubr.f32.mxu0 %v910_v25  ;;  %v911_v32 = vmax.f32 %v855_v27, 0.0 }
 0x1d7   : > { %v860_v30 = vpop.f32.mrf.mxu1  ;;  %1090 = vmatmul.mubr.f32.gmra.mxu0 %v909_v26 }
 0x1d8   : > { %v912_v31 = vmax.f32 %v857_v29, 0.0  ;;  %v861_v33 = vadd.f32 %v860_v30, %v2472_v60 }
 0x1d9   : > { %v862_v34 = vpop.f32.mrf.mxu1 }
 0x1da   : > { %v863_v35 = vadd.f32 %v862_v34, %v2476_v61  ;;  %1094 = vmatprep.mubr.f32.mxu0 %v912_v31  ;;  %v913_v38 = vmax.f32 %v861_v33, 0.0 }
 0x1db   : > { %v866_v36 = vpop.f32.mrf.mxu1  ;;  %1095 = vmatmul.mubr.f32.gmra.mxu0 %v911_v32 }
 0x1dc   : > { %v914_v37 = vmax.f32 %v863_v35, 0.0  ;;  %v867_v39 = vadd.f32 %v866_v36, %v2472_v60 }
 0x1dd   : > { %v868_v40 = vpop.f32.mrf.mxu1 }
 0x1de   : > { %v869_v20 = vadd.f32 %v868_v40, %v2476_v61  ;;  %1099 = vmatprep.mubr.f32.mxu0 %v914_v37  ;;  %v915_v43 = vmax.f32 %v867_v39, 0.0 }
 0x1df   : > { %v872_v41 = vpop.f32.mrf.mxu1  ;;  %1100 = vmatmul.mubr.f32.gmra.mxu0 %v913_v38 }
 0x1e0   : > { %v916_v42 = vmax.f32 %v869_v20, 0.0  ;;  %v873_v44 = vadd.f32 %v872_v41, %v2472_v60 }
 0x1e1   : > { %v874_v45 = vpop.f32.mrf.mxu1 }
 0x1e2   : > { %v875_v46 = vadd.f32 %v874_v45, %v2476_v61  ;;  %1104 = vmatprep.mubr.f32.mxu0 %v916_v42  ;;  %v917_v49 = vmax.f32 %v873_v44, 0.0 }
 0x1e3   : > { %v878_v47 = vpop.f32.mrf.mxu1  ;;  %1105 = vmatmul.mubr.f32.gmra.mxu0 %v915_v43 }
 0x1e4   : > { %v918_v48 = vmax.f32 %v875_v46, 0.0  ;;  %v879_v50 = vadd.f32 %v878_v47, %v2472_v60  ;;  %v1372_v60 = vld [vmem:[%s2946_s9 + $0xf8] sm:$0xff] }
 0x1e5   : > { %v880_v51 = vpop.f32.mrf.mxu1  ;;  %1385 = vmatprep.subr.mxu0 %v1372_v60  ;;  %1909 = vmatprep.subr.mxu1 %v1372_v60 }
 0x1e6   : > { %v881_v52 = vadd.f32 %v880_v51, %v2476_v61  ;;  %1109 = vmatprep.mubr.f32.mxu0 %v918_v48  ;;  %v919_v55 = vmax.f32 %v879_v50, 0.0  ;;  %v2526_v61 = vld [vmem:[%s2946_s9 + $0xf0] sm:$0xff] }
 0x1e7   : > { %1110 = vmatmul.mubr.f32.gmra.mxu0 %v917_v49 }
 0x1e8   : > { %v920_v54 = vmax.f32 %v881_v52, 0.0  ;;  %1386 = vmatpush1.msra.mxu0 %v2526_v61 }
 0x1e9   : > { %1387 = vmatprep.subr.mxu0 %v2531_v58 }
 0x1ea   : > { %1114 = vmatprep.mubr.f32.mxu0 %v920_v54  ;;  %1388 = vmatpush1.msra.mxu0 %v2536_v62 }
 0x1eb   : > { %1115 = vmatmul.mubr.f32.gmra.mxu0 %v919_v55  ;;  %1389 = vmatprep.subr.mxu0 %v2542_v63 }
 0x1ec   : > { %1449 = vmatprep.mubr.f32.mxu0 %v1959_v1  ;;  %1390 = vmatpush1.msra.mxu0 %v2548_v0 }
 0x1ed   : > { %1391 = vmatprep.subr.mxu0 %v2554_v2 }
 0x1ee   : > { %1392 = vmatpush1.msra.mxu0 %v2560_v3 }
 0x1ef   : > { %1393 = vmatprep.subr.mxu0 %v2566_v4 }
 0x1f0   : > { %1394 = vmatpush1.msra.mxu0 %v2572_v5 }
 0x1f1   : > { %1395 = vmatprep.subr.mxu0 %v2578_v6 }
 0x1f2   : > { %1396 = vmatpush1.msra.mxu0 %v2584_v7 }
 0x1f3   : > { %1397 = vmatprep.subr.mxu0 %v2590_v8 }
 0x1f4   : > { %1398 = vmatpush1.msra.mxu0 %v2596_v9 }
 0x1f5   : > { %1399 = vmatprep.subr.mxu0 %v2602_v10 }
 0x1f6   : > { %1400 = vmatpush1.msra.mxu0 %v2608_v11 }
 0x1f7   : > { %1401 = vmatprep.subr.mxu0 %v2614_v12 }
 0x1f8   : > { %1402 = vmatpush1.msra.mxu0 %v2620_v13 }
 0x1f9   : > { %1403 = vmatprep.subr.mxu0 %v2626_v14 }
 0x1fa   : > { %1404 = vmatpush1.msra.mxu0 %v2632_v15 }
 0x1fb   : > { %1405 = vmatprep.subr.mxu0 %v2638_v16 }
 0x1fc   : > { %1406 = vmatpush1.msra.mxu0 %v2644_v17 }
 0x1fd   : > { %1407 = vmatprep.subr.mxu0 %v2650_v18 }
 0x1fe   : > { %1408 = vmatpush1.msra.mxu0 %v2656_v19 }
 0x1ff   : > { %1409 = vmatprep.subr.mxu0 %v2662_v21 }
 0x200   : > { %1410 = vmatpush1.msra.mxu0 %v2668_v22 }
 0x201   : > { %1411 = vmatprep.subr.mxu0 %v2674_v23 }
 0x263   : > { %v1026_v25 = vpop.f32.mrf.mxu0 }
 0x264   : > { %v1027_v26 = vadd.f32 %v2682_v24, %v1026_v25 }
 0x265   : > { %v1028_v27 = vpop.f32.mrf.mxu0 }
 0x266   : > { %v1120_v28 = vmax.f32 %v1027_v26, 0.0 }
 0x267   : > { %v1031_v29 = vpop.f32.mrf.mxu0 }
 0x268   : > { %v1032_v30 = vadd.f32 %v2682_v24, %v1031_v29  ;;  %1853 = vmatmul.mubr.f32.vlgmr.msra.gmra.mxu1 %v1120_v28 }
 0x269   : > { %v1033_v31 = vpop.f32.mrf.mxu0  ;;  %1855 = vmatprep.mubr.msk.f32.mxu1 %vm1960_vm0, %v1959_v1  ;;  %1925 = vmatpush1.msra.mxu1 %v2526_v61 }
 0x26a   : > { %v1121_v32 = vmax.f32 %v1032_v30, 0.0  ;;  %1910 = vmatprep.subr.mxu1 %v2531_v58 }
 0x26b   : > { %v1036_v33 = vpop.f32.mrf.mxu0  ;;  %1926 = vmatpush1.msra.mxu1 %v2536_v62 }
 0x26c   : > { %v1037_v34 = vadd.f32 %v2682_v24, %v1036_v33  ;;  %1856 = vmatmul.mubr.f32.gmra.mxu1 %v1121_v32  ;;  %1911 = vmatprep.subr.mxu1 %v2542_v63 }
 0x26d   : > { %v1038_v35 = vpop.f32.mrf.mxu0  ;;  %1858 = vmatprep.mubr.msk.f32.mxu1 %vm1960_vm0, %v1959_v1  ;;  %1927 = vmatpush1.msra.mxu1 %v2548_v0 }
 0x26e   : > { %v1122_v36 = vmax.f32 %v1037_v34, 0.0  ;;  %1912 = vmatprep.subr.mxu1 %v2554_v2  ;;  %v1345_v35 = vld [vmem:[%s2946_s9 + $0x20] sm:$0xff] }
 0x26f   : > { %v1041_v37 = vpop.f32.mrf.mxu0  ;;  %1928 = vmatpush1.msra.mxu1 %v2560_v3  ;;  %1412 = vmatpush1.msra.mxu0 %v1345_v35 }
 0x270   : > { %v1042_v38 = vadd.f32 %v2682_v24, %v1041_v37  ;;  %1859 = vmatmul.mubr.f32.gmra.mxu1 %v1122_v36  ;;  %1913 = vmatprep.subr.mxu1 %v2566_v4  ;;  %v1344_v37 = vld [vmem:[%s2946_s9 + $0x18] sm:$0xff] }
 0x271   : > { %v1043_v39 = vpop.f32.mrf.mxu0  ;;  %1861 = vmatprep.mubr.msk.f32.mxu1 %vm1960_vm0, %v1959_v1  ;;  %1929 = vmatpush1.msra.mxu1 %v2572_v5 }
 0x272   : > { %v1123_v40 = vmax.f32 %v1042_v38, 0.0  ;;  %1914 = vmatprep.subr.mxu1 %v2578_v6  ;;  %1413 = vmatprep.subr.mxu0 %v1344_v37  ;;  %v1343_v39 = vld [vmem:[%s2946_s9 + $0x10] sm:$0xff] }
 0x273   : > { %v1046_v20 = vpop.f32.mrf.mxu0  ;;  %1930 = vmatpush1.msra.mxu1 %v2584_v7  ;;  %1414 = vmatpush1.msra.mxu0 %v1343_v39 }
 0x274   : > { %v1047_v41 = vadd.f32 %v2682_v24, %v1046_v20  ;;  %1862 = vmatmul.mubr.f32.gmra.mxu1 %v1123_v40  ;;  %1915 = vmatprep.subr.mxu1 %v2590_v8  ;;  %v1342_v20 = vld [vmem:[%s2946_s9 + $0x8] sm:$0xff] }
 0x275   : > { %v1048_v42 = vpop.f32.mrf.mxu0  ;;  %1864 = vmatprep.mubr.msk.f32.mxu1 %vm1960_vm0, %v1959_v1  ;;  %1931 = vmatpush1.msra.mxu1 %v2596_v9 }
 0x276   : > { %v1124_v43 = vmax.f32 %v1047_v41, 0.0  ;;  %1916 = vmatprep.subr.mxu1 %v2602_v10  ;;  %1415 = vmatprep.subr.mxu0 %v1342_v20  ;;  %v1341_v42 = vld [vmem:[%s2946_s9] sm:$0xff] }
 0x277   : > { %v1051_v44 = vpop.f32.mrf.mxu0  ;;  %1932 = vmatpush1.msra.mxu1 %v2608_v11  ;;  %1416 = vmatpush1.msra.mxu0 %v1341_v42 }
 0x278   : > { %v1052_v45 = vadd.f32 %v2682_v24, %v1051_v44  ;;  %1865 = vmatmul.mubr.f32.gmra.mxu1 %v1124_v43  ;;  %1917 = vmatprep.subr.mxu1 %v2614_v12 }
 0x279   : > { %v1053_v46 = vpop.f32.mrf.mxu0  ;;  %1867 = vmatprep.mubr.msk.f32.mxu1 %vm1960_vm0, %v1959_v1  ;;  %1933 = vmatpush1.msra.mxu1 %v2620_v13 }
 0x27a   : > { %v1125_v47 = vmax.f32 %v1052_v45, 0.0  ;;  %1918 = vmatprep.subr.mxu1 %v2626_v14  ;;  %v2784_v46 = vld [vmem:[%s2945_s8] ss:$0 sm:$0xff] }
 0x27b   : > { %v1056_v48 = vpop.f32.mrf.mxu0  ;;  %1934 = vmatpush1.msra.mxu1 %v2632_v15 }
 0x27c   : > { %v1057_v49 = vadd.f32 %v2682_v24, %v1056_v48  ;;  %1868 = vmatmul.mubr.f32.gmra.mxu1 %v1125_v47  ;;  %1919 = vmatprep.subr.mxu1 %v2638_v16 }
 0x27d   : > { %v1058_v50 = vpop.f32.mrf.mxu0  ;;  %1870 = vmatprep.mubr.msk.f32.mxu1 %vm1960_vm0, %v1959_v1  ;;  %1935 = vmatpush1.msra.mxu1 %v2644_v17 }
 0x27e   : > { %v1126_v51 = vmax.f32 %v1057_v49, 0.0  ;;  %1920 = vmatprep.subr.mxu1 %v2650_v18 }
 0x27f   : > { %v1061_v52 = vpop.f32.mrf.mxu0  ;;  %1936 = vmatpush1.msra.mxu1 %v2656_v19 }
 0x280   : > { %v1062_v53 = vadd.f32 %v2682_v24, %v1061_v52  ;;  %1871 = vmatmul.mubr.f32.gmra.mxu1 %v1126_v51  ;;  %1921 = vmatprep.subr.mxu1 %v2662_v21 }
 0x281   : > { %v1063_v54 = vpop.f32.mrf.mxu0  ;;  %1873 = vmatprep.mubr.msk.f32.mxu1 %vm1960_vm0, %v1959_v1  ;;  %1937 = vmatpush1.msra.mxu1 %v2668_v22 }
 0x282   : > { %v1127_v55 = vmax.f32 %v1062_v53, 0.0  ;;  %1922 = vmatprep.subr.mxu1 %v2674_v23 }
 0x283   : > { %v1066_v60 = vpop.f32.mrf.mxu0  ;;  %1938 = vmatpush1.msra.mxu1 %v1345_v35 }
 0x284   : > { %v1067_v61 = vadd.f32 %v2682_v24, %v1066_v60  ;;  %1874 = vmatmul.mubr.f32.gmra.mxu1 %v1127_v55  ;;  %1923 = vmatprep.subr.mxu1 %v1344_v37 }
 0x285   : > { %v1068_v58 = vpop.f32.mrf.mxu0  ;;  %1876 = vmatprep.mubr.msk.f32.mxu1 %vm1960_vm0, %v1959_v1  ;;  %1939 = vmatpush1.msra.mxu1 %v1343_v39 }
 0x286   : > { %v1128_v62 = vmax.f32 %v1067_v61, 0.0  ;;  %1924 = vmatprep.subr.mxu1 %v1342_v20 }
 0x287   : > { %v1071_v63 = vpop.f32.mrf.mxu0  ;;  %1940 = vmatpush1.msra.mxu1 %v1341_v42 }
 0x288   : > { %v1072_v0 = vadd.f32 %v2682_v24, %v1071_v63  ;;  %1877 = vmatmul.mubr.f32.gmra.mxu1 %v1128_v62 }
 0x289   : > { %v1073_v2 = vpop.f32.mrf.mxu0  ;;  %1879 = vmatprep.mubr.msk.f32.mxu1 %vm1960_vm0, %v1959_v1 }
 0x28a   : > { %v1129_v3 = vmax.f32 %v1072_v0, 0.0 }
 0x28b   : > { %v1076_v4 = vpop.f32.mrf.mxu0 }
 0x28c   : > { %v1077_v5 = vadd.f32 %v2682_v24, %v1076_v4  ;;  %1880 = vmatmul.mubr.f32.gmra.mxu1 %v1129_v3 }
 0x28d   : > { %v1078_v6 = vpop.f32.mrf.mxu0  ;;  %1882 = vmatprep.mubr.msk.f32.mxu1 %vm1960_vm0, %v1959_v1 }
 0x28e   : > { %v1130_v7 = vmax.f32 %v1077_v5, 0.0 }
 0x28f   : > { %v1081_v8 = vpop.f32.mrf.mxu0 }
 0x290   : > { %v1082_v9 = vadd.f32 %v2682_v24, %v1081_v8  ;;  %1883 = vmatmul.mubr.f32.gmra.mxu1 %v1130_v7 }
 0x291   : > { %v1083_v10 = vpop.f32.mrf.mxu0  ;;  %1885 = vmatprep.mubr.msk.f32.mxu1 %vm1960_vm0, %v1959_v1 }
 0x292   : > { %v1131_v11 = vmax.f32 %v1082_v9, 0.0 }
 0x293   : > { %v1086_v12 = vpop.f32.mrf.mxu0 }
 0x294   : > { %v1087_v13 = vadd.f32 %v2682_v24, %v1086_v12  ;;  %1886 = vmatmul.mubr.f32.gmra.mxu1 %v1131_v11 }
 0x295   : > { %v1088_v14 = vpop.f32.mrf.mxu0  ;;  %1888 = vmatprep.mubr.msk.f32.mxu1 %vm1960_vm0, %v1959_v1 }
 0x296   : > { %v1132_v15 = vmax.f32 %v1087_v13, 0.0 }
 0x297   : > { %v1091_v16 = vpop.f32.mrf.mxu0 }
 0x298   : > { %v1092_v17 = vadd.f32 %v2682_v24, %v1091_v16  ;;  %1889 = vmatmul.mubr.f32.gmra.mxu1 %v1132_v15 }
 0x299   : > { %v1093_v18 = vpop.f32.mrf.mxu0  ;;  %1891 = vmatprep.mubr.msk.f32.mxu1 %vm1960_vm0, %v1959_v1 }
 0x29a   : > { %v1133_v19 = vmax.f32 %v1092_v17, 0.0 }
 0x29b   : > { %v1096_v21 = vpop.f32.mrf.mxu0 }
 0x29c   : > { %v1097_v22 = vadd.f32 %v2682_v24, %v1096_v21  ;;  %1892 = vmatmul.mubr.f32.gmra.mxu1 %v1133_v19 }
 0x29d   : > { %v1098_v23 = vpop.f32.mrf.mxu0  ;;  %1894 = vmatprep.mubr.msk.f32.mxu1 %vm1960_vm0, %v1959_v1 }
 0x29e   : > { %v1134_v25 = vmax.f32 %v1097_v22, 0.0 }
 0x29f   : > { %v1101_v26 = vpop.f32.mrf.mxu0 }
 0x2a0   : > { %v1102_v27 = vadd.f32 %v2682_v24, %v1101_v26  ;;  %1895 = vmatmul.mubr.f32.gmra.mxu1 %v1134_v25 }
 0x2a1   : > { %v1103_v28 = vpop.f32.mrf.mxu0  ;;  %1897 = vmatprep.mubr.msk.f32.mxu1 %vm1960_vm0, %v1959_v1 }
 0x2a2   : > { %v1135_v29 = vmax.f32 %v1102_v27, 0.0 }
 0x2a3   : > { %v1106_v30 = vpop.f32.mrf.mxu0 }
 0x2a4   : > { %v1107_v31 = vadd.f32 %v2682_v24, %v1106_v30  ;;  %1898 = vmatmul.mubr.f32.gmra.mxu1 %v1135_v29 }
 0x2a5   : > { %v1108_v32 = vpop.f32.mrf.mxu0  ;;  %1900 = vmatprep.mubr.msk.f32.mxu1 %vm1960_vm0, %v1959_v1 }
 0x2a6   : > { %v1136_v33 = vmax.f32 %v1107_v31, 0.0 }
 0x2a7   : > { %v1111_v34 = vpop.f32.mrf.mxu0 }
 0x2a8   : > { %v1112_v36 = vadd.f32 %v2682_v24, %v1111_v34  ;;  %1901 = vmatmul.mubr.f32.gmra.mxu1 %v1136_v33 }
 0x2a9   : > { %v1113_v38 = vpop.f32.mrf.mxu0  ;;  %1903 = vmatprep.mubr.msk.f32.mxu1 %vm1960_vm0, %v1959_v1 }
 0x2aa   : > { %v1137_v40 = vmax.f32 %v1112_v36, 0.0 }
 0x2ab   : > { %v1116_v41 = vpop.f32.mrf.mxu0 }
 0x2ac   : > { %v1117_v43 = vadd.f32 %v2682_v24, %v1116_v41  ;;  %1904 = vmatmul.mubr.f32.gmra.mxu1 %v1137_v40 }
 0x2ad   : > { %v1118_v44 = vpop.f32.mrf.mxu0  ;;  %1906 = vmatprep.mubr.msk.f32.mxu1 %vm1960_vm0, %v1959_v1 }
 0x2ae   : > { %v1138_v45 = vmax.f32 %v1117_v43, 0.0 }
 0x2b0   : > { %1907 = vmatmul.mubr.f32.gmra.mxu1 %v1138_v45 }
 0x2b1   : > { %1527 = vmatprep.mubr.f32.mxu1 %v1959_v1 }
 0x328   : > { %v1228_v47 = vpop.f32.mrf.mxu1 }
 0x329   : > { %v1229_v24 = vadd.f32 %v2784_v46, %v1228_v47 }
 0x32a   : > { %v1854_v48 = vpop.f32.mrf.mxu1 }
 0x32b   : > { %v1322_v49 = vmax.f32 %v1229_v24, 0.0 }
 0x32c   : > { %v1233_v50 = vpop.f32.mrf.mxu1 }
 0x32d   : > { %v1234_v51 = vadd.f32 %v2784_v46, %v1233_v50  ;;  %1450 = vmatmul.mubr.f32.vlgmr.msra.gmra.mxu0 %v1322_v49 }
 0x32e   : > { %v1857_v52 = vpop.f32.mrf.mxu1  ;;  %1455 = vmatprep.mubr.f32.mxu0 %v1959_v1 }
 0x32f   : > { %v1323_v53 = vmax.f32 %v1234_v51, 0.0 }
 0x330   : > { %v1238_v54 = vpop.f32.mrf.mxu1 }
 0x331   : > { %v1239_v55 = vadd.f32 %v2784_v46, %v1238_v54  ;;  %1456 = vmatmul.mubr.f32.gmra.mxu0 %v1323_v53 }
 0x332   : > { %v1860_v60 = vpop.f32.mrf.mxu1  ;;  %1461 = vmatprep.mubr.f32.mxu0 %v1959_v1 }
 0x333   : > { %v1324_v61 = vmax.f32 %v1239_v55, 0.0 }
 0x334   : > { %v1243_v58 = vpop.f32.mrf.mxu1 }
 0x335   : > { %v1244_v62 = vadd.f32 %v2784_v46, %v1243_v58  ;;  %1462 = vmatmul.mubr.f32.gmra.mxu0 %v1324_v61 }
 0x336   : > { %v1863_v63 = vpop.f32.mrf.mxu1  ;;  %1467 = vmatprep.mubr.f32.mxu0 %v1959_v1 }
 0x337   : > { %v1325_v0 = vmax.f32 %v1244_v62, 0.0 }
 0x338   : > { %v1248_v2 = vpop.f32.mrf.mxu1 }
 0x339   : > { %v1249_v3 = vadd.f32 %v2784_v46, %v1248_v2  ;;  %1468 = vmatmul.mubr.f32.gmra.mxu0 %v1325_v0 }
 0x33a   : > { %v1866_v4 = vpop.f32.mrf.mxu1  ;;  %1473 = vmatprep.mubr.f32.mxu0 %v1959_v1 }
 0x33b   : > { %v1326_v5 = vmax.f32 %v1249_v3, 0.0  ;;  %v1373_v3 = vld [vmem:[%s2947_s10] sm:$0x3] }
 0x33c   : > { %v1253_v6 = vpop.f32.mrf.mxu1  ;;  %v2828_v4 = vrot.slane %v1373_v3, %v696_v57 }
 0x33d   : > { %v1254_v7 = vadd.f32 %v2784_v46, %v1253_v6  ;;  %1474 = vmatmul.mubr.f32.gmra.mxu0 %v1326_v5  ;;  %v2832_v5 = vrot.slane %v1373_v3, %v700_v59 }
 0x33e   : > { %v1869_v8 = vpop.f32.mrf.mxu1  ;;  %1479 = vmatprep.mubr.f32.mxu0 %v1959_v1 }
 0x33f   : > { %v1327_v9 = vmax.f32 %v1254_v7, 0.0 }
 0x340   : > { %v1258_v10 = vpop.f32.mrf.mxu1 }
 0x341   : > { %v1259_v11 = vadd.f32 %v2784_v46, %v1258_v10  ;;  %1480 = vmatmul.mubr.f32.gmra.mxu0 %v1327_v9 }
 0x342   : > { %v1872_v12 = vpop.f32.mrf.mxu1  ;;  %1485 = vmatprep.mubr.f32.mxu0 %v1959_v1 }
 0x343   : > { %v1328_v13 = vmax.f32 %v1259_v11, 0.0 }
 0x344   : > { %v1263_v14 = vpop.f32.mrf.mxu1 }
 0x345   : > { %v1264_v15 = vadd.f32 %v2784_v46, %v1263_v14  ;;  %1486 = vmatmul.mubr.f32.gmra.mxu0 %v1328_v13 }
 0x346   : > { %v1875_v16 = vpop.f32.mrf.mxu1  ;;  %1491 = vmatprep.mubr.f32.mxu0 %v1959_v1 }
 0x347   : > { %v1329_v17 = vmax.f32 %v1264_v15, 0.0 }
 0x348   : > { %v1268_v18 = vpop.f32.mrf.mxu1 }
 0x349   : > { %v1269_v19 = vadd.f32 %v2784_v46, %v1268_v18  ;;  %1492 = vmatmul.mubr.f32.gmra.mxu0 %v1329_v17 }
 0x34a   : > { %v1878_v21 = vpop.f32.mrf.mxu1  ;;  %1497 = vmatprep.mubr.f32.mxu0 %v1959_v1 }
 0x34b   : > { %v1330_v22 = vmax.f32 %v1269_v19, 0.0 }
 0x34c   : > { %v1273_v23 = vpop.f32.mrf.mxu1 }
 0x34d   : > { %v1274_v25 = vadd.f32 %v2784_v46, %v1273_v23  ;;  %1498 = vmatmul.mubr.f32.gmra.mxu0 %v1330_v22 }
 0x34e   : > { %v1881_v26 = vpop.f32.mrf.mxu1  ;;  %1503 = vmatprep.mubr.f32.mxu0 %v1959_v1 }
 0x34f   : > { %v1331_v27 = vmax.f32 %v1274_v25, 0.0 }
 0x350   : > { %v1278_v28 = vpop.f32.mrf.mxu1 }
 0x351   : > { %v1279_v29 = vadd.f32 %v2784_v46, %v1278_v28  ;;  %1504 = vmatmul.mubr.f32.gmra.mxu0 %v1331_v27 }
 0x352   : > { %v1884_v30 = vpop.f32.mrf.mxu1  ;;  %1509 = vmatprep.mubr.f32.mxu0 %v1959_v1 }
 0x353   : > { %v1332_v31 = vmax.f32 %v1279_v29, 0.0 }
 0x354   : > { %v1283_v32 = vpop.f32.mrf.mxu1 }
 0x355   : > { %v1284_v33 = vadd.f32 %v2784_v46, %v1283_v32  ;;  %1510 = vmatmul.mubr.f32.gmra.mxu0 %v1332_v31 }
 0x356   : > { %v1887_v34 = vpop.f32.mrf.mxu1  ;;  %1515 = vmatprep.mubr.f32.mxu0 %v1959_v1 }
 0x357   : > { %v1333_v35 = vmax.f32 %v1284_v33, 0.0 }
 0x358   : > { %v1288_v36 = vpop.f32.mrf.mxu1 }
 0x359   : > { %v1289_v37 = vadd.f32 %v2784_v46, %v1288_v36  ;;  %1516 = vmatmul.mubr.f32.gmra.mxu0 %v1333_v35 }
 0x35a   : > { %v1890_v38 = vpop.f32.mrf.mxu1  ;;  %1521 = vmatprep.mubr.f32.mxu0 %v1959_v1 }
 0x35b   : > { %v1334_v39 = vmax.f32 %v1289_v37, 0.0 }
 0x35c   : > { %v1293_v40 = vpop.f32.mrf.mxu1 }
 0x35d   : > { %v1294_v20 = vadd.f32 %v2784_v46, %v1293_v40  ;;  %1522 = vmatmul.mubr.f32.gmra.mxu0 %v1334_v39 }
 0x35e   : > { %v1893_v41 = vpop.f32.mrf.mxu1 }
 0x35f   : > { %v1335_v42 = vmax.f32 %v1294_v20, 0.0 }
 0x360   : > { %v1298_v43 = vpop.f32.mrf.mxu1 }
 0x361   : > { %v1299_v44 = vadd.f32 %v2784_v46, %v1298_v43  ;;  %1528 = vmatmul.mubr.f32.vlgmr.msra.gmra.mxu1 %v1335_v42 }
 0x362   : > { %v1896_v45 = vpop.f32.mrf.mxu1  ;;  %1533 = vmatprep.mubr.f32.mxu1 %v1959_v1 }
 0x363   : > { %v1336_v47 = vmax.f32 %v1299_v44, 0.0 }
 0x364   : > { %v1303_v24 = vpop.f32.mrf.mxu1 }
 0x365   : > { %v1304_v48 = vadd.f32 %v2784_v46, %v1303_v24  ;;  %1534 = vmatmul.mubr.f32.gmra.mxu1 %v1336_v47 }
 0x366   : > { %v1899_v49 = vpop.f32.mrf.mxu1  ;;  %1539 = vmatprep.mubr.f32.mxu1 %v1959_v1 }
 0x367   : > { %v1337_v50 = vmax.f32 %v1304_v48, 0.0 }
 0x368   : > { %v1308_v51 = vpop.f32.mrf.mxu1 }
 0x369   : > { %v1309_v52 = vadd.f32 %v2784_v46, %v1308_v51  ;;  %1540 = vmatmul.mubr.f32.gmra.mxu1 %v1337_v50 }
 0x36a   : > { %v1902_v53 = vpop.f32.mrf.mxu1  ;;  %1545 = vmatprep.mubr.f32.mxu1 %v1959_v1 }
 0x36b   : > { %v1338_v54 = vmax.f32 %v1309_v52, 0.0 }
 0x36c   : > { %v1313_v55 = vpop.f32.mrf.mxu1 }
 0x36d   : > { %v1314_v60 = vadd.f32 %v2784_v46, %v1313_v55  ;;  %1546 = vmatmul.mubr.f32.gmra.mxu1 %v1338_v54 }
 0x36e   : > { %v1905_v61 = vpop.f32.mrf.mxu1  ;;  %1551 = vmatprep.mubr.f32.mxu1 %v1959_v1 }
 0x36f   : > { %v1339_v58 = vmax.f32 %v1314_v60, 0.0 }
 0x370   : > { %v1318_v62 = vpop.f32.mrf.mxu1 }
 0x371   : > { %v1319_v63 = vadd.f32 %v2784_v46, %v1318_v62  ;;  %1552 = vmatmul.mubr.f32.gmra.mxu1 %v1339_v58 }
 0x372   : > { %v1908_v0 = vpop.f32.mrf.mxu1  ;;  %1557 = vmatprep.mubr.f32.mxu1 %v1959_v1 }
 0x373   : > { %v1340_v2 = vmax.f32 %v1319_v63, 0.0 }
 0x375   : > { %1558 = vmatmul.mubr.f32.gmra.mxu1 %v1340_v2 }
 0x3ed   : > { %v1451_v1 = vpop.f32.mrf.mxu0 }
 0x3ee   : > { %v1452_v46 = vadd.f32 %v1451_v1, %v2828_v4 }
 0x3ef   : > { %v1453_v6 = vpop.f32.mrf.mxu0 }
 0x3f0   : > { %1564 = vst [vmem:[%s2837_s18] sm:$0xff] %v1452_v46  ;;  %v1454_v56 = vadd.f32 %v1453_v6, %v2832_v5 }
 0x3f1   : > { %v1457_v57 = vpop.f32.mrf.mxu0 }
 0x3f2   : > { %1566 = vst.msk [vmem:[%s2837_s18 + $0x8] sm:$0xff] %vm1565_vm2, %v1454_v56  ;;  %v1458_v59 = vadd.f32 %v1457_v57, %v2828_v4 }
 0x3f3   : > { %v1459_v7 = vpop.f32.mrf.mxu0 }
 0x3f4   : > { %1567 = vst [vmem:[%s2837_s18 + $0x10] sm:$0xff] %v1458_v59  ;;  %v1460_v8 = vadd.f32 %v1459_v7, %v2832_v5 }
 0x3f5   : > { %v1463_v9 = vpop.f32.mrf.mxu0 }
 0x3f6   : > { %1568 = vst.msk [vmem:[%s2837_s18 + $0x18] sm:$0xff] %vm1565_vm2, %v1460_v8  ;;  %v1464_v10 = vadd.f32 %v1463_v9, %v2828_v4 }
 0x3f7   : > { %v1465_v11 = vpop.f32.mrf.mxu0 }
 0x3f8   : > { %1569 = vst [vmem:[%s2837_s18 + $0x20] sm:$0xff] %v1464_v10  ;;  %v1466_v12 = vadd.f32 %v1465_v11, %v2832_v5 }
 0x3f9   : > { %v1469_v13 = vpop.f32.mrf.mxu0 }
 0x3fa   : > { %1570 = vst.msk [vmem:[%s2837_s18 + $0x28] sm:$0xff] %vm1565_vm2, %v1466_v12  ;;  %v1470_v14 = vadd.f32 %v1469_v13, %v2828_v4 }
 0x3fb   : > { %v1471_v15 = vpop.f32.mrf.mxu0 }
 0x3fc   : > { %1571 = vst [vmem:[%s2837_s18 + $0x30] sm:$0xff] %v1470_v14  ;;  %v1472_v16 = vadd.f32 %v1471_v15, %v2832_v5 }
 0x3fd   : > { %v1475_v17 = vpop.f32.mrf.mxu0 }
 0x3fe   : > { %1572 = vst.msk [vmem:[%s2837_s18 + $0x38] sm:$0xff] %vm1565_vm2, %v1472_v16  ;;  %v1476_v18 = vadd.f32 %v1475_v17, %v2828_v4 }
 0x3ff   : > { %v1477_v19 = vpop.f32.mrf.mxu0 }
 0x400   : > { %1573 = vst [vmem:[%s2837_s18 + $0x40] sm:$0xff] %v1476_v18  ;;  %v1478_v21 = vadd.f32 %v1477_v19, %v2832_v5 }
 0x401   : > { %v1481_v22 = vpop.f32.mrf.mxu0 }
 0x402   : > { %1574 = vst.msk [vmem:[%s2837_s18 + $0x48] sm:$0xff] %vm1565_vm2, %v1478_v21  ;;  %v1482_v23 = vadd.f32 %v1481_v22, %v2828_v4 }
 0x403   : > { %v1483_v25 = vpop.f32.mrf.mxu0 }
 0x404   : > { %1575 = vst [vmem:[%s2837_s18 + $0x50] sm:$0xff] %v1482_v23  ;;  %v1484_v26 = vadd.f32 %v1483_v25, %v2832_v5 }
 0x405   : > { %v1487_v27 = vpop.f32.mrf.mxu0 }
 0x406   : > { %1576 = vst.msk [vmem:[%s2837_s18 + $0x58] sm:$0xff] %vm1565_vm2, %v1484_v26  ;;  %v1488_v28 = vadd.f32 %v1487_v27, %v2828_v4 }
 0x407   : > { %v1489_v29 = vpop.f32.mrf.mxu0 }
 0x408   : > { %1577 = vst [vmem:[%s2837_s18 + $0x60] sm:$0xff] %v1488_v28  ;;  %v1490_v30 = vadd.f32 %v1489_v29, %v2832_v5 }
 0x409   : > { %v1493_v31 = vpop.f32.mrf.mxu0 }
 0x40a   : > { %1578 = vst.msk [vmem:[%s2837_s18 + $0x68] sm:$0xff] %vm1565_vm2, %v1490_v30  ;;  %v1494_v32 = vadd.f32 %v1493_v31, %v2828_v4 }
 0x40b   : > { %v1495_v33 = vpop.f32.mrf.mxu0 }
 0x40c   : > { %1579 = vst [vmem:[%s2837_s18 + $0x70] sm:$0xff] %v1494_v32  ;;  %v1496_v34 = vadd.f32 %v1495_v33, %v2832_v5 }
 0x40d   : > { %v1499_v35 = vpop.f32.mrf.mxu0 }
 0x40e   : > { %1580 = vst.msk [vmem:[%s2837_s18 + $0x78] sm:$0xff] %vm1565_vm2, %v1496_v34  ;;  %v1500_v36 = vadd.f32 %v1499_v35, %v2828_v4 }
 0x40f   : > { %v1501_v37 = vpop.f32.mrf.mxu0 }
 0x410   : > { %1581 = vst [vmem:[%s2837_s18 + $0x80] sm:$0xff] %v1500_v36  ;;  %v1502_v38 = vadd.f32 %v1501_v37, %v2832_v5 }
 0x411   : > { %v1505_v39 = vpop.f32.mrf.mxu0 }
 0x412   : > { %1582 = vst.msk [vmem:[%s2837_s18 + $0x88] sm:$0xff] %vm1565_vm2, %v1502_v38  ;;  %v1506_v40 = vadd.f32 %v1505_v39, %v2828_v4 }
 0x413   : > { %v1507_v20 = vpop.f32.mrf.mxu0 }
 0x414   : > { %1583 = vst [vmem:[%s2837_s18 + $0x90] sm:$0xff] %v1506_v40  ;;  %v1508_v41 = vadd.f32 %v1507_v20, %v2832_v5 }
 0x415   : > { %v1511_v42 = vpop.f32.mrf.mxu0 }
 0x416   : > { %1584 = vst.msk [vmem:[%s2837_s18 + $0x98] sm:$0xff] %vm1565_vm2, %v1508_v41  ;;  %v1512_v43 = vadd.f32 %v1511_v42, %v2828_v4 }
 0x417   : > { %v1513_v44 = vpop.f32.mrf.mxu0 }
 0x418   : > { %1585 = vst [vmem:[%s2837_s18 + $0xa0] sm:$0xff] %v1512_v43  ;;  %v1514_v45 = vadd.f32 %v1513_v44, %v2832_v5 }
 0x419   : > { %v1517_v47 = vpop.f32.mrf.mxu0 }
 0x41a   : > { %1586 = vst.msk [vmem:[%s2837_s18 + $0xa8] sm:$0xff] %vm1565_vm2, %v1514_v45  ;;  %v1518_v24 = vadd.f32 %v1517_v47, %v2828_v4 }
 0x41b   : > { %v1519_v48 = vpop.f32.mrf.mxu0 }
 0x41c   : > { %1587 = vst [vmem:[%s2837_s18 + $0xb0] sm:$0xff] %v1518_v24  ;;  %v1520_v49 = vadd.f32 %v1519_v48, %v2832_v5 }
 0x41d   : > { %v1523_v50 = vpop.f32.mrf.mxu0 }
 0x41e   : > { %1588 = vst.msk [vmem:[%s2837_s18 + $0xb8] sm:$0xff] %vm1565_vm2, %v1520_v49  ;;  %v1524_v51 = vadd.f32 %v1523_v50, %v2828_v4 }
 0x41f   : > { %v1525_v52 = vpop.f32.mrf.mxu0 }
 0x420   : > { %1589 = vst [vmem:[%s2837_s18 + $0xc0] sm:$0xff] %v1524_v51  ;;  %v1526_v53 = vadd.f32 %v1525_v52, %v2832_v5 }
 0x421   : > { %v1529_v54 = vpop.f32.mrf.mxu1 }
 0x422   : > { %1590 = vst.msk [vmem:[%s2837_s18 + $0xc8] sm:$0xff] %vm1565_vm2, %v1526_v53  ;;  %v1530_v55 = vadd.f32 %v1529_v54, %v2828_v4 }
 0x423   : > { %v1531_v60 = vpop.f32.mrf.mxu1 }
 0x424   : > { %1591 = vst [vmem:[%s2837_s18 + $0xd0] sm:$0xff] %v1530_v55  ;;  %v1532_v61 = vadd.f32 %v1531_v60, %v2832_v5 }
 0x425   : > { %v1535_v58 = vpop.f32.mrf.mxu1 }
 0x426   : > { %1592 = vst.msk [vmem:[%s2837_s18 + $0xd8] sm:$0xff] %vm1565_vm2, %v1532_v61  ;;  %v1536_v62 = vadd.f32 %v1535_v58, %v2828_v4 }
 0x427   : > { %v1537_v63 = vpop.f32.mrf.mxu1 }
 0x428   : > { %1593 = vst [vmem:[%s2837_s18 + $0xe0] sm:$0xff] %v1536_v62  ;;  %v1538_v0 = vadd.f32 %v1537_v63, %v2832_v5 }
 0x429   : > { %v1541_v2 = vpop.f32.mrf.mxu1 }
 0x42a   : > { %1594 = vst.msk [vmem:[%s2837_s18 + $0xe8] sm:$0xff] %vm1565_vm2, %v1538_v0  ;;  %v1542_v3 = vadd.f32 %v1541_v2, %v2828_v4 }
 0x42b   : > { %v1543_v1 = vpop.f32.mrf.mxu1 }
 0x42c   : > { %1595 = vst [vmem:[%s2837_s18 + $0xf0] sm:$0xff] %v1542_v3  ;;  %v1544_v46 = vadd.f32 %v1543_v1, %v2832_v5 }
 0x42d   : > { %v1547_v6 = vpop.f32.mrf.mxu1 }
 0x42e   : > { %1596 = vst.msk [vmem:[%s2837_s18 + $0xf8] sm:$0xff] %vm1565_vm2, %v1544_v46  ;;  %v1548_v56 = vadd.f32 %v1547_v6, %v2828_v4 }
 0x42f   : > { %v1549_v57 = vpop.f32.mrf.mxu1 }
 0x430   : > { %1597 = vst [vmem:[%s2837_s18 + $0x100] sm:$0xff] %v1548_v56  ;;  %v1550_v59 = vadd.f32 %v1549_v57, %v2832_v5 }
 0x431   : > { %v1553_v7 = vpop.f32.mrf.mxu1 }
 0x432   : > { %1598 = vst.msk [vmem:[%s2837_s18 + $0x108] sm:$0xff] %vm1565_vm2, %v1550_v59  ;;  %v1554_v8 = vadd.f32 %v1553_v7, %v2828_v4 }
 0x433   : > { %v1555_v9 = vpop.f32.mrf.mxu1 }
 0x434   : > { %1599 = vst [vmem:[%s2837_s18 + $0x110] sm:$0xff] %v1554_v8  ;;  %v1556_v10 = vadd.f32 %v1555_v9, %v2832_v5 }
 0x435   : > { %v1559_v11 = vpop.f32.mrf.mxu1 }
 0x436   : > { %1600 = vst.msk [vmem:[%s2837_s18 + $0x118] sm:$0xff] %vm1565_vm2, %v1556_v10  ;;  %v1560_v12 = vadd.f32 %v1559_v11, %v2828_v4 }
 0x437   : > { %v1561_v13 = vpop.f32.mrf.mxu1 }
 0x438   : > { %1601 = vst [vmem:[%s2837_s18 + $0x120] sm:$0xff] %v1560_v12  ;;  %v1562_v14 = vadd.f32 %v1561_v13, %v2832_v5 }
 0x43a   : > { %1602 = vst.msk [vmem:[%s2837_s18 + $0x128] sm:$0xff] %vm1565_vm2, %v1562_v14 }
 0x43b PF: > { %s21_s17 = sadd.s32 1, %s1957_s17  }
 0x43c   : > { %p18_p4 = scmp.ge.s32.totalorder %s21_s17, 4  }
 0x43e   :  { %20 = sbr.rel (!%p18_p4) target bundleno = 1 (0x1), region = 94 }

</bundles_post_ra>
